<compile_context>
chip_gen: v5e
topology: v5e:2x2
jax: 0.10.0
libtpu: 0.0.40
codegen_flags: <defaults>
</compile_context>

<pallas_src>
import jax
import jax.numpy as jnp
from jax.experimental import pallas as pl
from jax.experimental.pallas import tpu as pltpu

IN_DIM = 9 ** 3      # 729
HIDDEN = 200
LATENT = 16          # latent_dim for the synthetic example

# lane / MXU friendly padded sizes
IN_PAD = 768         # 6 * 128
HID_PAD = 256        # 2 * 128
LAT_PAD = 128        # full lane tile (also the fc3 K dim)
MAX_TB = 256         # batch tile (sized for v7x's smaller VMEM as well)


def _round_up(x, m):
    return (x + m - 1) // m * m


def _vae_kernel(x_ref, eps_ref,
                w1_ref, b1_ref,
                w2x_ref, b2x_ref,
                w3_ref, b3_ref,
                w4_ref, b4_ref,
                recon_ref, mulv_ref):
    # ---- encode (bf16 MXU operands, fp32 accumulation) ----
    x = x_ref[...].astype(jnp.bfloat16)
    h1 = jnp.dot(x, w1_ref[...], preferred_element_type=jnp.float32) + b1_ref[...]
    h1 = jnp.maximum(h1, 0.0)                                     # ReLU (fp32 VPU)

    # fused mu/logvar head: one (HID_PAD, 2*LAT_PAD) matmul, lane-dense output
    mulv = jnp.dot(h1.astype(jnp.bfloat16), w2x_ref[...],
                   preferred_element_type=jnp.float32) + b2x_ref[...]
    mu = mulv[:, :LAT_PAD]
    logvar = mulv[:, LAT_PAD:]

    # ---- reparameterize in fp32 (eps supplied from host for determinism) ----
    std = jnp.exp(0.5 * logvar)
    z = mu + eps_ref[...] * std

    # ---- decode ----
    h3 = jnp.dot(z.astype(jnp.bfloat16), w3_ref[...],
                 preferred_element_type=jnp.float32) + b3_ref[...]
    h3 = jnp.maximum(h3, 0.0)
    logits = jnp.dot(h3.astype(jnp.bfloat16), w4_ref[...],
                     preferred_element_type=jnp.float32) + b4_ref[...]

    recon_ref[...] = jax.nn.sigmoid(logits)                       # fp32 EUP
    mulv_ref[...] = mulv


def init_params(key):
    """Deterministic parameter init; Linear weights stored as (in, out), fp32."""
    def linear(k, fan_in, fan_out):
        kw, kb = jax.random.split(k)
        bound = 1.0 / jnp.sqrt(fan_in)
        w = jax.random.uniform(kw, (fan_in, fan_out), jnp.float32, -bound, bound)
        b = jax.random.uniform(kb, (1, fan_out), jnp.float32, -bound, bound)
        return w, b

    k1, k2, k3, k4, k5 = jax.random.split(key, 5)
    w1, b1 = linear(k1, IN_DIM, HIDDEN)
    w21, b21 = linear(k2, HIDDEN, LATENT)
    w22, b22 = linear(k3, HIDDEN, LATENT)
    w3, b3 = linear(k4, LATENT, HIDDEN)
    w4, b4 = linear(k5, HIDDEN, IN_DIM)
    return dict(w1=w1, b1=b1, w21=w21, b21=b21, w22=w22, b22=b22,
                w3=w3, b3=b3, w4=w4, b4=b4)


def pack_params(params):
    """Zero-pad to MXU/lane friendly shapes; weights -> bf16, biases stay fp32."""
    def pad2(a, r, c):
        return jnp.zeros((r, c), a.dtype).at[:a.shape[0], :a.shape[1]].set(a)

    w1 = pad2(params["w1"], IN_PAD, HID_PAD).astype(jnp.bfloat16)
    b1 = pad2(params["b1"], 1, HID_PAD)
    w2x = jnp.concatenate([pad2(params["w21"], HID_PAD, LAT_PAD),
                           pad2(params["w22"], HID_PAD, LAT_PAD)],
                          axis=1).astype(jnp.bfloat16)
    b2x = jnp.concatenate([pad2(params["b21"], 1, LAT_PAD),
                           pad2(params["b22"], 1, LAT_PAD)], axis=1)
    w3 = pad2(params["w3"], LAT_PAD, HID_PAD).astype(jnp.bfloat16)
    b3 = pad2(params["b3"], 1, HID_PAD)
    w4 = pad2(params["w4"], HID_PAD, IN_PAD).astype(jnp.bfloat16)
    b4 = pad2(params["b4"], 1, IN_PAD)
    return (w1, b1, w2x, b2x, w3, b3, w4, b4)


def vae_forward(x, eps, packed):
    """x: (B, 9, 9, 9) or (B, 729) float32; eps: (B, LATENT) float32."""
    xb = x.reshape(-1, IN_DIM).astype(jnp.float32)    # matches torch x.view(-1, 9**3)
    B = xb.shape[0]

    tb = min(MAX_TB, _round_up(B, 8))                 # full sublanes, MXU-friendly M
    b_pad = _round_up(B, tb)
    grid = (b_pad // tb,)

    x_pad = jnp.zeros((b_pad, IN_PAD), jnp.float32).at[:B, :IN_DIM].set(xb)
    eps_pad = jnp.zeros((b_pad, LAT_PAD), jnp.float32).at[:B, :LATENT].set(eps)

    w1, b1, w2x, b2x, w3, b3, w4, b4 = packed

    def batch_spec(feat):
        return pl.BlockSpec((tb, feat), lambda i: (i, 0))

    def resident_spec(a):                              # constant index map -> stays in VMEM
        return pl.BlockSpec(a.shape, lambda i: (0, 0))

    flops = 2 * b_pad * (IN_PAD * HID_PAD + HID_PAD * 2 * LAT_PAD
                         + LAT_PAD * HID_PAD + HID_PAD * IN_PAD)
    transcendentals = b_pad * (IN_PAD + LAT_PAD)       # sigmoid + exp(0.5*logvar)
    weight_bytes = sum(int(a.size) * a.dtype.itemsize
                       for a in (w1, b1, w2x, b2x, w3, b3, w4, b4))
    io_bytes = (int(x_pad.size) * 4 + int(eps_pad.size) * 4
                + b_pad * IN_PAD * 4 + b_pad * 2 * LAT_PAD * 4)
    cost = pl.CostEstimate(flops=int(flops),
                           transcendentals=int(transcendentals),
                           bytes_accessed=int(weight_bytes + io_bytes))

    recon_pad, mulv = pl.pallas_call(
        _vae_kernel,
        out_shape=(
            jax.ShapeDtypeStruct((b_pad, IN_PAD), jnp.float32),
            jax.ShapeDtypeStruct((b_pad, 2 * LAT_PAD), jnp.float32),
        ),
        grid=grid,
        in_specs=[
            batch_spec(IN_PAD),        # x tile
            batch_spec(LAT_PAD),       # eps tile
            resident_spec(w1), resident_spec(b1),
            resident_spec(w2x), resident_spec(b2x),
            resident_spec(w3), resident_spec(b3),
            resident_spec(w4), resident_spec(b4),
        ],
        out_specs=(
            batch_spec(IN_PAD),        # recon (lane-dense 768-wide store)
            batch_spec(2 * LAT_PAD),   # fused mu|logvar (lane-dense 256-wide store)
        ),
        compiler_params=pltpu.CompilerParams(
            dimension_semantics=("parallel",),
            vmem_limit_bytes=32 * 1024 * 1024,
        ),
        cost_estimate=cost,
    )(x_pad, eps_pad, w1, b1, w2x, b2x, w3, b3, w4, b4)

    recon = recon_pad[:B, :IN_DIM]
    mu = mulv[:B, :LATENT]
    logvar = mulv[:B, LAT_PAD:LAT_PAD + LATENT]
    return recon, mu, logvar


if __name__ == "__main__":
    key = jax.random.PRNGKey(0)
    kp, kx, ke = jax.random.split(key, 3)

    params = init_params(kp)
    packed = pack_params(params)

    x = jax.random.normal(kx, (2, 9, 9, 9), jnp.float32)    # batch=2 volume input
    eps = jax.random.normal(ke, (2, LATENT), jnp.float32)   # reparameterization noise
    # TODO(synk): torch uses in-module randn_like for eps; supplied from host here
    # for determinism (could use pltpu.prng_random_bits in-kernel instead).

    recon, mu, logvar = vae_forward(x, eps, packed)
    jax.block_until_ready((recon, mu, logvar))

    # sanity: fp32 reference in plain JAX (kernel uses bf16 MXU operands,
    # so compare with a correspondingly loose tolerance)
    xb = x.reshape(-1, IN_DIM)
    h1 = jnp.maximum(xb @ params["w1"] + params["b1"], 0.0)
    mu_ref = h1 @ params["w21"] + params["b21"]
    lv_ref = h1 @ params["w22"] + params["b22"]
    z = mu_ref + eps * jnp.exp(0.5 * lv_ref)
    h3 = jnp.maximum(z @ params["w3"] + params["b3"], 0.0)
    recon_ref = jax.nn.sigmoid(h3 @ params["w4"] + params["b4"])

    assert recon.shape == (2, IN_DIM)
    assert mu.shape == (2, LATENT) and logvar.shape == (2, LATENT)
    assert jnp.allclose(recon, recon_ref, atol=2e-2)
    assert jnp.allclose(mu, mu_ref, atol=2e-2)
    assert jnp.allclose(logvar, lv_ref, atol=2e-2)

    print("KERNEL_OK")
</pallas_src>

<mosaic_0001>
module attributes {stable_mosaic.version = 11 : i64} {
  func.func @_vae_kernel(%arg0: i32, %arg1: memref<8x768xf32, #tpu.memory_space<vmem>>, %arg2: memref<8x128xf32, #tpu.memory_space<vmem>>, %arg3: memref<768x256xbf16, #tpu.memory_space<vmem>>, %arg4: memref<1x256xf32, #tpu.memory_space<vmem>>, %arg5: memref<256x256xbf16, #tpu.memory_space<vmem>>, %arg6: memref<1x256xf32, #tpu.memory_space<vmem>>, %arg7: memref<128x256xbf16, #tpu.memory_space<vmem>>, %arg8: memref<1x256xf32, #tpu.memory_space<vmem>>, %arg9: memref<256x768xbf16, #tpu.memory_space<vmem>>, %arg10: memref<1x768xf32, #tpu.memory_space<vmem>>, %arg11: memref<8x768xf32, #tpu.memory_space<vmem>>, %arg12: memref<8x256xf32, #tpu.memory_space<vmem>>) attributes {dimension_semantics = [#tpu.dimension_semantics<parallel>], iteration_bounds = array<i64: 1>, scalar_prefetch = 0 : i64, scratch_operands = 0 : i64, tpu.core_type = #tpu.core_type<tc>, window_params = [{transform_indices = @transform_0, window_bounds = array<i64: 8, 768>}, {transform_indices = @transform_1, window_bounds = array<i64: 8, 128>}, {pipeline_mode = #tpu.pipeline_mode<synchronous>, transform_indices = @transform_2, window_bounds = array<i64: 768, 256>}, {pipeline_mode = #tpu.pipeline_mode<synchronous>, transform_indices = @transform_3, window_bounds = array<i64: 1, 256>}, {pipeline_mode = #tpu.pipeline_mode<synchronous>, transform_indices = @transform_4, window_bounds = array<i64: 256, 256>}, {pipeline_mode = #tpu.pipeline_mode<synchronous>, transform_indices = @transform_5, window_bounds = array<i64: 1, 256>}, {pipeline_mode = #tpu.pipeline_mode<synchronous>, transform_indices = @transform_6, window_bounds = array<i64: 128, 256>}, {pipeline_mode = #tpu.pipeline_mode<synchronous>, transform_indices = @transform_7, window_bounds = array<i64: 1, 256>}, {pipeline_mode = #tpu.pipeline_mode<synchronous>, transform_indices = @transform_8, window_bounds = array<i64: 256, 768>}, {pipeline_mode = #tpu.pipeline_mode<synchronous>, transform_indices = @transform_9, window_bounds = array<i64: 1, 768>}, {transform_indices = @transform_10, window_bounds = array<i64: 8, 768>}, {transform_indices = @transform_11, window_bounds = array<i64: 8, 256>}]} {
    %c0 = arith.constant 0 : index
    %c0_0 = arith.constant 0 : index
    %0 = vector.load %arg1[%c0, %c0_0] : memref<8x768xf32, #tpu.memory_space<vmem>>, vector<8x768xf32>
    %1 = arith.truncf %0 : vector<8x768xf32> to vector<8x768xbf16>
    %c0_1 = arith.constant 0 : index
    %c0_2 = arith.constant 0 : index
    %2 = vector.load %arg3[%c0_1, %c0_2] : memref<768x256xbf16, #tpu.memory_space<vmem>>, vector<768x256xbf16>
    %cst = arith.constant dense<0.000000e+00> : vector<8x256xf32>
    %3 = tpu.matmul %1, %2, %cst {dimension_numbers = #tpu.dot_dimension_numbers<[1], [0], [0], [1], [0, 0, 1, 1], [], []>} : vector<8x768xbf16>, vector<768x256xbf16>, vector<8x256xf32> -> vector<8x256xf32>
    %c0_3 = arith.constant 0 : index
    %c0_4 = arith.constant 0 : index
    %4 = vector.load %arg4[%c0_3, %c0_4] : memref<1x256xf32, #tpu.memory_space<vmem>>, vector<1x256xf32>
    %5 = vector.broadcast %4 : vector<1x256xf32> to vector<8x256xf32>
    %6 = arith.addf %3, %5 : vector<8x256xf32>
    %cst_5 = arith.constant 0.000000e+00 : f32
    %7 = vector.broadcast %cst_5 : f32 to vector<8x256xf32>
    %8 = arith.maximumf %6, %7 : vector<8x256xf32>
    %9 = arith.truncf %8 : vector<8x256xf32> to vector<8x256xbf16>
    %c0_6 = arith.constant 0 : index
    %c0_7 = arith.constant 0 : index
    %10 = vector.load %arg5[%c0_6, %c0_7] : memref<256x256xbf16, #tpu.memory_space<vmem>>, vector<256x256xbf16>
    %cst_8 = arith.constant dense<0.000000e+00> : vector<8x256xf32>
    %11 = tpu.matmul %9, %10, %cst_8 {dimension_numbers = #tpu.dot_dimension_numbers<[1], [0], [0], [1], [0, 0, 1, 1], [], []>} : vector<8x256xbf16>, vector<256x256xbf16>, vector<8x256xf32> -> vector<8x256xf32>
    %c0_9 = arith.constant 0 : index
    %c0_10 = arith.constant 0 : index
    %12 = vector.load %arg6[%c0_9, %c0_10] : memref<1x256xf32, #tpu.memory_space<vmem>>, vector<1x256xf32>
    %13 = vector.broadcast %12 : vector<1x256xf32> to vector<8x256xf32>
    %14 = arith.addf %11, %13 : vector<8x256xf32>
    %15 = vector.extract_strided_slice %14 {offsets = [0, 0], sizes = [8, 128], strides = [1, 1]} : vector<8x256xf32> to vector<8x128xf32>
    %16 = vector.extract_strided_slice %14 {offsets = [0, 128], sizes = [8, 128], strides = [1, 1]} : vector<8x256xf32> to vector<8x128xf32>
    %cst_11 = arith.constant 5.000000e-01 : f32
    %17 = vector.broadcast %cst_11 : f32 to vector<8x128xf32>
    %18 = arith.mulf %17, %16 : vector<8x128xf32>
    %19 = math.exp %18 : vector<8x128xf32>
    %c0_12 = arith.constant 0 : index
    %c0_13 = arith.constant 0 : index
    %20 = vector.load %arg2[%c0_12, %c0_13] : memref<8x128xf32, #tpu.memory_space<vmem>>, vector<8x128xf32>
    %21 = arith.mulf %20, %19 : vector<8x128xf32>
    %22 = arith.addf %15, %21 : vector<8x128xf32>
    %23 = arith.truncf %22 : vector<8x128xf32> to vector<8x128xbf16>
    %c0_14 = arith.constant 0 : index
    %c0_15 = arith.constant 0 : index
    %24 = vector.load %arg7[%c0_14, %c0_15] : memref<128x256xbf16, #tpu.memory_space<vmem>>, vector<128x256xbf16>
    %cst_16 = arith.constant dense<0.000000e+00> : vector<8x256xf32>
    %25 = tpu.matmul %23, %24, %cst_16 {dimension_numbers = #tpu.dot_dimension_numbers<[1], [0], [0], [1], [0, 0, 1, 1], [], []>} : vector<8x128xbf16>, vector<128x256xbf16>, vector<8x256xf32> -> vector<8x256xf32>
    %c0_17 = arith.constant 0 : index
    %c0_18 = arith.constant 0 : index
    %26 = vector.load %arg8[%c0_17, %c0_18] : memref<1x256xf32, #tpu.memory_space<vmem>>, vector<1x256xf32>
    %27 = vector.broadcast %26 : vector<1x256xf32> to vector<8x256xf32>
    %28 = arith.addf %25, %27 : vector<8x256xf32>
    %cst_19 = arith.constant 0.000000e+00 : f32
    %29 = vector.broadcast %cst_19 : f32 to vector<8x256xf32>
    %30 = arith.maximumf %28, %29 : vector<8x256xf32>
    %31 = arith.truncf %30 : vector<8x256xf32> to vector<8x256xbf16>
    %c0_20 = arith.constant 0 : index
    %c0_21 = arith.constant 0 : index
    %32 = vector.load %arg9[%c0_20, %c0_21] : memref<256x768xbf16, #tpu.memory_space<vmem>>, vector<256x768xbf16>
    %cst_22 = arith.constant dense<0.000000e+00> : vector<8x768xf32>
    %33 = tpu.matmul %31, %32, %cst_22 {dimension_numbers = #tpu.dot_dimension_numbers<[1], [0], [0], [1], [0, 0, 1, 1], [], []>} : vector<8x256xbf16>, vector<256x768xbf16>, vector<8x768xf32> -> vector<8x768xf32>
    %c0_23 = arith.constant 0 : index
    %c0_24 = arith.constant 0 : index
    %34 = vector.load %arg10[%c0_23, %c0_24] : memref<1x768xf32, #tpu.memory_space<vmem>>, vector<1x768xf32>
    %35 = vector.broadcast %34 : vector<1x768xf32> to vector<8x768xf32>
    %36 = arith.addf %33, %35 : vector<8x768xf32>
    %37 = arith.negf %36 : vector<8x768xf32>
    %38 = math.exp %37 : vector<8x768xf32>
    %cst_25 = arith.constant 1.000000e+00 : f32
    %39 = vector.broadcast %cst_25 : f32 to vector<8x768xf32>
    %40 = arith.addf %39, %38 : vector<8x768xf32>
    %41 = arith.divf %39, %40 : vector<8x768xf32>
    %c0_26 = arith.constant 0 : index
    %c0_27 = arith.constant 0 : index
    %42 = vector.load %arg11[%c0_26, %c0_27] : memref<8x768xf32, #tpu.memory_space<vmem>>, vector<8x768xf32>
    tpu.vector_store %arg11[%c0_26, %c0_27], %41 {strides = array<i32>} : memref<8x768xf32, #tpu.memory_space<vmem>>, vector<8x768xf32>,
    %c0_28 = arith.constant 0 : index
    %c0_29 = arith.constant 0 : index
    %43 = vector.load %arg12[%c0_28, %c0_29] : memref<8x256xf32, #tpu.memory_space<vmem>>, vector<8x256xf32>
    tpu.vector_store %arg12[%c0_28, %c0_29], %14 {strides = array<i32>} : memref<8x256xf32, #tpu.memory_space<vmem>>, vector<8x256xf32>,
    return
  }
  func.func @transform_0(%arg0: i32) -> (i32, i32) {
    %c0_i32 = arith.constant 0 : i32
    %c0_i32_0 = arith.constant 0 : i32
    return %arg0, %c0_i32 : i32, i32
  }
  func.func @transform_1(%arg0: i32) -> (i32, i32) {
    %c0_i32 = arith.constant 0 : i32
    %c0_i32_0 = arith.constant 0 : i32
    return %arg0, %c0_i32 : i32, i32
  }
  func.func @transform_2(%arg0: i32) -> (i32, i32) {
    %c0_i32 = arith.constant 0 : i32
    %c0_i32_0 = arith.constant 0 : i32
    %c0_i32_1 = arith.constant 0 : i32
    return %c0_i32, %c0_i32_0 : i32, i32
  }
  func.func @transform_3(%arg0: i32) -> (i32, i32) {
    %c0_i32 = arith.constant 0 : i32
    %c0_i32_0 = arith.constant 0 : i32
    %c0_i32_1 = arith.constant 0 : i32
    return %c0_i32, %c0_i32_0 : i32, i32
  }
  func.func @transform_4(%arg0: i32) -> (i32, i32) {
    %c0_i32 = arith.constant 0 : i32
    %c0_i32_0 = arith.constant 0 : i32
    %c0_i32_1 = arith.constant 0 : i32
    return %c0_i32, %c0_i32_0 : i32, i32
  }
  func.func @transform_5(%arg0: i32) -> (i32, i32) {
    %c0_i32 = arith.constant 0 : i32
    %c0_i32_0 = arith.constant 0 : i32
    %c0_i32_1 = arith.constant 0 : i32
    return %c0_i32, %c0_i32_0 : i32, i32
  }
  func.func @transform_6(%arg0: i32) -> (i32, i32) {
    %c0_i32 = arith.constant 0 : i32
    %c0_i32_0 = arith.constant 0 : i32
    %c0_i32_1 = arith.constant 0 : i32
    return %c0_i32, %c0_i32_0 : i32, i32
  }
  func.func @transform_7(%arg0: i32) -> (i32, i32) {
    %c0_i32 = arith.constant 0 : i32
    %c0_i32_0 = arith.constant 0 : i32
    %c0_i32_1 = arith.constant 0 : i32
    return %c0_i32, %c0_i32_0 : i32, i32
  }
  func.func @transform_8(%arg0: i32) -> (i32, i32) {
    %c0_i32 = arith.constant 0 : i32
    %c0_i32_0 = arith.constant 0 : i32
    %c0_i32_1 = arith.constant 0 : i32
    return %c0_i32, %c0_i32_0 : i32, i32
  }
  func.func @transform_9(%arg0: i32) -> (i32, i32) {
    %c0_i32 = arith.constant 0 : i32
    %c0_i32_0 = arith.constant 0 : i32
    %c0_i32_1 = arith.constant 0 : i32
    return %c0_i32, %c0_i32_0 : i32, i32
  }
  func.func @transform_10(%arg0: i32) -> (i32, i32) {
    %c0_i32 = arith.constant 0 : i32
    %c0_i32_0 = arith.constant 0 : i32
    return %arg0, %c0_i32 : i32, i32
  }
  func.func @transform_11(%arg0: i32) -> (i32, i32) {
    %c0_i32 = arith.constant 0 : i32
    %c0_i32_0 = arith.constant 0 : i32
    return %arg0, %c0_i32 : i32, i32
  }
}

</mosaic_0001>

<bundles_post_ra>
// kernel: tpu_custom_call.1
= control target key start
LH: loop header
LB: loop body
LE: loop exit
PB: predicated region body
PF: predicated region fallthrough
CT: control target
= control target key end

     0   :  { %17 = vsyncpa [#allocation3], 0  ;;  %s3876_s0 = inlined_call_operand.hbm [shape: f32[8,768], index: 0, kind: input, shape index: {}]   ;;  %s3877_s1 = inlined_call_operand.hbm [shape: f32[8,128], index: 1, kind: input, shape index: {}]   ;;  %s3878_s2 = inlined_call_operand.hbm [shape: bf16[768,256], index: 2, kind: input, shape index: {}]   ;;  %s3879_s3 = inlined_call_operand.vmem [shape: f32[1,256], index: 3, kind: input, shape index: {}]   ;;  %s3880_s4 = inlined_call_operand.hbm [shape: bf16[256,256], index: 4, kind: input, shape index: {}]   ;;  %s3881_s5 = inlined_call_operand.hbm [shape: f32[1,256], index: 5, kind: input, shape index: {}]   ;;  %s3882_s6 = inlined_call_operand.hbm [shape: bf16[128,256], index: 6, kind: input, shape index: {}]   ;;  %s3883_s7 = inlined_call_operand.hbm [shape: f32[1,256], index: 7, kind: input, shape index: {}]   ;;  %s3884_s8 = inlined_call_operand.hbm [shape: bf16[256,768], index: 8, kind: input, shape index: {}]   ;;  %s3885_s9 = inlined_call_operand.vmem [shape: f32[1,768], index: 9, kind: input, shape index: {}]   ;;  %s3886_s10 = inlined_call_operand.hbm [shape: f32[8,768], index: 10, kind: output, shape index: {0}]   ;;  %s3887_s11 = inlined_call_operand.hbm [shape: f32[8,256], index: 11, kind: output, shape index: {1}]  }
   0x1   :  { %18 = vsyncpa [#allocation6], 0 }
   0x2   :  { %19 = vsyncpa [#allocation9], 0 }
   0x3   :  { %20 = vsyncpa [#allocation12], 0 }
   0x4   :  { %21 = vsyncpa [#allocation15], 0 }
   0x5   :  { %22 = vsyncpa [#allocation4], 0  ;;  %s40_s19 = sshll.u32 %s3877_s1, 4  ;;  %s41_s19 = int_to_ptr.hbm [resolvable:$true] %s40_s19 }
   0x6   :  { %23 = vsyncpa [#allocation18], 0  ;;  %s3704_s20 = smov [#allocation5]   ;;  %s65_s24 = sshll.u32 %s3880_s4, 4  ;;  %s66_s24 = int_to_ptr.hbm [resolvable:$true] %s65_s24 }
   0x7   :  { %s42_s21 = sshll.u32 %s3704_s20, 4  ;;  %s3705_s25 = smov [#allocation8]   ;;  %s43_s21 = int_to_ptr.vmem [resolvable:$true] %s42_s21 }
   0x8   :  { %45 = dma.hbm_to_vmem [thread:$0]  %s41_s19, 128, %s43_s21, [#allocation6]  }
   0x9   :  { %s67_s26 = sshll.u32 %s3705_s25, 4  ;;  %s89_s29 = sshll.u32 %s3882_s6, 4  ;;  %s68_s26 = int_to_ptr.vmem [resolvable:$true] %s67_s26  ;;  %s90_s29 = int_to_ptr.hbm [resolvable:$true] %s89_s29 }
   0xa   :  { %s3706_s1 = smov 128   ;;  %s3707_s30 = smov 8  }
   0xb   :  { %73 = dma.hbm_to_vmem [thread:$0]  %s66_s24, 4096, %s68_s26, [#allocation9], %s3706_s1, %s3706_s1, %s3707_s30  }
   0xc   :  { %s29_s14 = sshll.u32 %s3876_s0, 4  ;;  %s3708_s15 = smov [#allocation11]   ;;  %s30_s14 = int_to_ptr.hbm [resolvable:$true] %s29_s14 }
   0xd   :  { %s91_s16 = sshll.u32 %s3708_s15, 4  ;;  %s3709_s4 = smov [#allocation2]   ;;  %s92_s16 = int_to_ptr.vmem [resolvable:$true] %s91_s16 }
   0xe   :  { %97 = dma.hbm_to_vmem [thread:$0]  %s90_s29, 2048, %s92_s16, [#allocation12], %s3706_s1, %s3706_s1, %s3707_s30  }
   0xf   :  { %s31_s17 = sshll.u32 %s3709_s4, 4  ;;  %s50_s6 = sshll.u32 %s3878_s2, 4  ;;  %s32_s17 = int_to_ptr.vmem [resolvable:$true] %s31_s17  ;;  %s51_s6 = int_to_ptr.hbm [resolvable:$true] %s50_s6 }
  0x10   :  { %34 = dma.hbm_to_vmem [thread:$0]  %s30_s14, 768, %s32_s17, [#allocation3]  }
  0x11   :  { %s79_s22 = sshll.u32 %s3881_s5, 4  ;;  %s3710_s23 = smov [#allocation7]   ;;  %s80_s22 = int_to_ptr.hbm [resolvable:$true] %s79_s22 }
  0x12   :  { %s52_s0 = sshll.u32 %s3710_s23, 4  ;;  %s3711_s24 = smov [#allocation10]   ;;  %s53_s0 = int_to_ptr.vmem [resolvable:$true] %s52_s0 }
  0x13   :  { %58 = dma.hbm_to_vmem [thread:$0]  %s51_s6, 12288, %s53_s0, [#allocation6], %s3706_s1, %s3706_s1, %s3707_s30  }
  0x14   :  { %s81_s25 = sshll.u32 %s3711_s24, 4  ;;  %s103_s28 = sshll.u32 %s3883_s7, 4  ;;  %s82_s25 = int_to_ptr.vmem [resolvable:$true] %s81_s25  ;;  %s104_s28 = int_to_ptr.hbm [resolvable:$true] %s103_s28 }
  0x15   :  { %84 = dma.hbm_to_vmem [thread:$0]  %s80_s22, 32, %s82_s25, [#allocation9]  }
  0x16   :  { %s113_s12 = sshll.u32 %s3884_s8, 4  ;;  %s3712_s13 = smov [#allocation13]   ;;  %s114_s12 = int_to_ptr.hbm [resolvable:$true] %s113_s12 }
  0x17   :  { %s105_s5 = sshll.u32 %s3712_s13, 4  ;;  %s3713_s14 = smov [#allocation14]   ;;  %s106_s5 = int_to_ptr.vmem [resolvable:$true] %s105_s5 }
  0x18   :  { %108 = dma.hbm_to_vmem [thread:$0]  %s104_s28, 32, %s106_s5, [#allocation12]  }
  0x19   :  { %s115_s1 = sshll.u32 %s3713_s14, 4  ;;  %s3714_s30 = smov 384   ;;  %s116_s1 = int_to_ptr.vmem [resolvable:$true] %s115_s1 }
  0x1a   :  { %s3715_s15 = smov 24  }
  0x1b   :  { %121 = dma.hbm_to_vmem [thread:$0]  %s114_s12, 12288, %s116_s1, [#allocation15], %s3714_s30, %s3714_s30, %s3715_s15  }
  0x1c   :  { %3690 = dma.done.wait [#allocation3], 768  }
  0x1d   :  { %3691 = vsyncadd [#allocation3], 4294966528 }
  0x1e   :  { %3692 = dma.done.wait [#allocation6], 12416  }
  0x1f   :  { %3693 = vsyncadd [#allocation6], 4294954880 }
  0x20   :  { %3694 = dma.done.wait [#allocation9], 4128  }
  0x21   :  { %3695 = vsyncadd [#allocation9], 4294963168 }
  0x22   :  { %3696 = dma.done.wait [#allocation12], 2080  }
  0x23   :  { %3697 = vsyncadd [#allocation12], 4294965216 }
  0x24   :  { %3698 = dma.done.wait [#allocation15], 12288  }
  0x25   :  { %3699 = vsyncadd [#allocation15], 4294955008  ;;  %v2262_v0 = vld [vmem:[#allocation7 + $0x70] sm:$0xf]  ;;  %v3185_v1 = vld [vmem:[#allocation7 + $0x74] sm:$0xf0] }
  0x26   :  { %v2326_v2 = vld [vmem:[#allocation7 + $0xf0] sm:$0xf]  ;;  %v2263_v3 = vor.u32 %v3185_v1, %v2262_v0  ;;  %v3201_v4 = vld [vmem:[#allocation7 + $0xf4] sm:$0xf0]  ;;  %v2254_v11 = vld [vmem:[#allocation7 + $0x60] sm:$0xf] }
  0x27   :  { %v2390_v5 = vld [vmem:[#allocation7 + $0x170] sm:$0xf]  ;;  %v3217_v6 = vld [vmem:[#allocation7 + $0x174] sm:$0xf0]  ;;  %v2327_v7 = vor.u32 %v3201_v4, %v2326_v2  ;;  %v3183_v13 = vld [vmem:[#allocation7 + $0x64] sm:$0xf0] }
  0x28   :  { %v2391_v8 = vor.u32 %v3217_v6, %v2390_v5  ;;  %v2454_v9 = vld [vmem:[#allocation7 + $0x1f0] sm:$0xf]  ;;  %v3233_v10 = vld [vmem:[#allocation7 + $0x1f4] sm:$0xf0]  ;;  %750 = vmatpush.bf16.msra.mxu0 %v2263_v3  ;;  %v2318_v14 = vld [vmem:[#allocation7 + $0xe0] sm:$0xf]  ;;  %v2255_v16 = vor.u32 %v3183_v13, %v2254_v11 }
  0x29   :  { %v2455_v12 = vor.u32 %v3233_v10, %v2454_v9  ;;  %v3199_v15 = vld [vmem:[#allocation7 + $0xe4] sm:$0xf0]  ;;  %763 = vmatpush.bf16.msra.mxu1 %v2327_v7  ;;  %v2382_v18 = vld [vmem:[#allocation7 + $0x160] sm:$0xf]  ;;  %v2246_v23 = vld [vmem:[#allocation7 + $0x50] sm:$0xf] }
  0x2a   :  { %776 = vmatpush.bf16.msra.mxu2 %v2391_v8  ;;  %v2319_v17 = vor.u32 %v3199_v15, %v2318_v14  ;;  %v3215_v19 = vld [vmem:[#allocation7 + $0x164] sm:$0xf0]  ;;  %v2446_v20 = vld [vmem:[#allocation7 + $0x1e0] sm:$0xf]  ;;  %v3181_v24 = vld [vmem:[#allocation7 + $0x54] sm:$0xf0] }
  0x2b   :  { %789 = vmatpush.bf16.msra.mxu3 %v2455_v12  ;;  %v2383_v21 = vor.u32 %v3215_v19, %v2382_v18  ;;  %v3231_v22 = vld [vmem:[#allocation7 + $0x1e4] sm:$0xf0]  ;;  %v2310_v26 = vld [vmem:[#allocation7 + $0xd0] sm:$0xf]  ;;  %v3197_v27 = vld [vmem:[#allocation7 + $0xd4] sm:$0xf0]  ;;  %v2247_v29 = vor.u32 %v3181_v24, %v2246_v23 }
  0x2c   :  { %v2447_v25 = vor.u32 %v3231_v22, %v2446_v20  ;;  %v2374_v28 = vld [vmem:[#allocation7 + $0x150] sm:$0xf]  ;;  %751 = vmatpush.bf16.msra.mxu0 %v2255_v16  ;;  %v3213_v30 = vld [vmem:[#allocation7 + $0x154] sm:$0xf0]  ;;  %v2311_v33 = vor.u32 %v3197_v27, %v2310_v26  ;;  %v2238_v35 = vld [vmem:[#allocation7 + $0x40] sm:$0xf] }
  0x2d   :  { %v2438_v31 = vld [vmem:[#allocation7 + $0x1d0] sm:$0xf]  ;;  %v3229_v32 = vld [vmem:[#allocation7 + $0x1d4] sm:$0xf0]  ;;  %764 = vmatpush.bf16.msra.mxu1 %v2319_v17  ;;  %v2375_v34 = vor.u32 %v3213_v30, %v2374_v28  ;;  %v3179_v36 = vld [vmem:[#allocation7 + $0x44] sm:$0xf0] }
  0x2e   :  { %777 = vmatpush.bf16.msra.mxu2 %v2383_v21  ;;  %v2302_v37 = vld [vmem:[#allocation7 + $0xc0] sm:$0xf]  ;;  %v2439_v38 = vor.u32 %v3229_v32, %v2438_v31  ;;  %v3195_v39 = vld [vmem:[#allocation7 + $0xc4] sm:$0xf0]  ;;  %v2239_v44 = vor.u32 %v3179_v36, %v2238_v35  ;;  %v2230_v47 = vld [vmem:[#allocation7 + $0x30] sm:$0xf] }
  0x2f   :  { %790 = vmatpush.bf16.msra.mxu3 %v2447_v25  ;;  %v2366_v40 = vld [vmem:[#allocation7 + $0x140] sm:$0xf]  ;;  %v3211_v41 = vld [vmem:[#allocation7 + $0x144] sm:$0xf0]  ;;  %v2303_v45 = vor.u32 %v3195_v39, %v2302_v37  ;;  %v3177_v48 = vld [vmem:[#allocation7 + $0x34] sm:$0xf0] }
  0x30   :  { %v2430_v42 = vld [vmem:[#allocation7 + $0x1c0] sm:$0xf]  ;;  %v3227_v43 = vld [vmem:[#allocation7 + $0x1c4] sm:$0xf0]  ;;  %752 = vmatpush.bf16.msra.mxu0 %v2247_v29  ;;  %v2367_v46 = vor.u32 %v3211_v41, %v2366_v40  ;;  %v2294_v49 = vld [vmem:[#allocation7 + $0xb0] sm:$0xf]  ;;  %v2231_v56 = vor.u32 %v3177_v48, %v2230_v47 }
  0x31   :  { %765 = vmatpush.bf16.msra.mxu1 %v2311_v33  ;;  %v2431_v50 = vor.u32 %v3227_v43, %v2430_v42  ;;  %v3193_v51 = vld [vmem:[#allocation7 + $0xb4] sm:$0xf0]  ;;  %v2358_v52 = vld [vmem:[#allocation7 + $0x130] sm:$0xf]  ;;  %v2222_v59 = vld [vmem:[#allocation7 + $0x20] sm:$0xf] }
  0x32   :  { %778 = vmatpush.bf16.msra.mxu2 %v2375_v34  ;;  %v3209_v53 = vld [vmem:[#allocation7 + $0x134] sm:$0xf0]  ;;  %v2422_v54 = vld [vmem:[#allocation7 + $0x1b0] sm:$0xf]  ;;  %v2295_v57 = vor.u32 %v3193_v51, %v2294_v49  ;;  %v3175_v60 = vld [vmem:[#allocation7 + $0x24] sm:$0xf0] }
  0x33   :  { %791 = vmatpush.bf16.msra.mxu3 %v2439_v38  ;;  %v3225_v55 = vld [vmem:[#allocation7 + $0x1b4] sm:$0xf0]  ;;  %v2359_v58 = vor.u32 %v3209_v53, %v2358_v52  ;;  %v2286_v61 = vld [vmem:[#allocation7 + $0xa0] sm:$0xf]  ;;  %v3191_v63 = vld [vmem:[#allocation7 + $0xa4] sm:$0xf0]  ;;  %v2223_v4 = vor.u32 %v3175_v60, %v2222_v59 }
  0x34   :  { %753 = vmatpush.bf16.msra.mxu0 %v2239_v44  ;;  %v2423_v62 = vor.u32 %v3225_v55, %v2422_v54  ;;  %v2350_v0 = vld [vmem:[#allocation7 + $0x120] sm:$0xf]  ;;  %v3207_v1 = vld [vmem:[#allocation7 + $0x124] sm:$0xf0]  ;;  %v2287_v5 = vor.u32 %v3191_v63, %v2286_v61  ;;  %v2214_v7 = vld [vmem:[#allocation7 + $0x10] sm:$0xf] }
  0x35   :  { %766 = vmatpush.bf16.msra.mxu1 %v2303_v45  ;;  %v2414_v2 = vld [vmem:[#allocation7 + $0x1a0] sm:$0xf]  ;;  %v3223_v3 = vld [vmem:[#allocation7 + $0x1a4] sm:$0xf0]  ;;  %v2351_v6 = vor.u32 %v3207_v1, %v2350_v0  ;;  %v3173_v8 = vld [vmem:[#allocation7 + $0x14] sm:$0xf0] }
  0x36   :  { %779 = vmatpush.bf16.msra.mxu2 %v2367_v46  ;;  %v2278_v9 = vld [vmem:[#allocation7 + $0x90] sm:$0xf]  ;;  %v2415_v10 = vor.u32 %v3223_v3, %v2414_v2  ;;  %v3189_v11 = vld [vmem:[#allocation7 + $0x94] sm:$0xf0]  ;;  %v2215_v16 = vor.u32 %v3173_v8, %v2214_v7  ;;  %v2206_v17 = vld [vmem:[#allocation7] sm:$0xf] }
  0x37   :  { %792 = vmatpush.bf16.msra.mxu3 %v2431_v50  ;;  %v2342_v12 = vld [vmem:[#allocation7 + $0x110] sm:$0xf]  ;;  %v3205_v13 = vld [vmem:[#allocation7 + $0x114] sm:$0xf0]  ;;  %v3171_v18 = vld [vmem:[#allocation7 + $0x4] sm:$0xf0]  ;;  %v2279_v19 = vor.u32 %v3189_v11, %v2278_v9 }
  0x38   :  { %754 = vmatpush.bf16.msra.mxu0 %v2231_v56  ;;  %v2406_v14 = vld [vmem:[#allocation7 + $0x190] sm:$0xf]  ;;  %v3221_v15 = vld [vmem:[#allocation7 + $0x194] sm:$0xf0]  ;;  %v2343_v20 = vor.u32 %v3205_v13, %v2342_v12  ;;  %v2270_v21 = vld [vmem:[#allocation7 + $0x80] sm:$0xf]  ;;  %v2207_v31 = vor.u32 %v3171_v18, %v2206_v17 }
  0x39   :  { %767 = vmatpush.bf16.msra.mxu1 %v2295_v57  ;;  %v3187_v22 = vld [vmem:[#allocation7 + $0x84] sm:$0xf0]  ;;  %v2334_v23 = vld [vmem:[#allocation7 + $0x100] sm:$0xf]  ;;  %v2407_v24 = vor.u32 %v3221_v15, %v2406_v14  ;;  %v2518_v28 = vld [vmem:[#allocation7 + $0x270] sm:$0xf] }
  0x3a   :  { %780 = vmatpush.bf16.msra.mxu2 %v2359_v58  ;;  %v3203_v25 = vld [vmem:[#allocation7 + $0x104] sm:$0xf0]  ;;  %v2398_v26 = vld [vmem:[#allocation7 + $0x180] sm:$0xf]  ;;  %v3249_v29 = vld [vmem:[#allocation7 + $0x274] sm:$0xf0]  ;;  %v2271_v35 = vor.u32 %v3187_v22, %v2270_v21 }
  0x3b   :  { %793 = vmatpush.bf16.msra.mxu3 %v2423_v62  ;;  %v3219_v27 = vld [vmem:[#allocation7 + $0x184] sm:$0xf0]  ;;  %v2582_v30 = vld [vmem:[#allocation7 + $0x2f0] sm:$0xf]  ;;  %v3265_v32 = vld [vmem:[#allocation7 + $0x2f4] sm:$0xf0]  ;;  %v2335_v36 = vor.u32 %v3203_v25, %v2334_v23  ;;  %v2519_v40 = vor.u32 %v3249_v29, %v2518_v28 }
  0x3c   :  { %755 = vmatpush.bf16.msra.mxu0 %v2223_v4  ;;  %v3184_v33 = vld [vmem:[#allocation7 + $0x74] sm:$0xf]  ;;  %v2264_v34 = vld [vmem:[#allocation7 + $0x78] sm:$0xf0]  ;;  %v2399_v39 = vor.u32 %v3219_v27, %v2398_v26  ;;  %v2583_v41 = vor.u32 %v3265_v32, %v2582_v30  ;;  %v2510_v43 = vld [vmem:[#allocation7 + $0x260] sm:$0xf] }
  0x3d   :  { %768 = vmatpush.bf16.msra.mxu1 %v2287_v5  ;;  %v3200_v37 = vld [vmem:[#allocation7 + $0xf4] sm:$0xf]  ;;  %v2328_v38 = vld [vmem:[#allocation7 + $0xf8] sm:$0xf0]  ;;  %v2267_v42 = vor.u32 %v3184_v33, %v2264_v34  ;;  %v3247_v44 = vld [vmem:[#allocation7 + $0x264] sm:$0xf0] }
  0x3e   :  { %781 = vmatpush.bf16.msra.mxu2 %v2351_v6  ;;  %v2574_v45 = vld [vmem:[#allocation7 + $0x2e0] sm:$0xf]  ;;  %v2331_v46 = vor.u32 %v3200_v37, %v2328_v38  ;;  %v3263_v47 = vld [vmem:[#allocation7 + $0x2e4] sm:$0xf0]  ;;  %v3182_v48 = vld [vmem:[#allocation7 + $0x64] sm:$0xf]  ;;  %v2511_v53 = vor.u32 %v3247_v44, %v2510_v43 }
  0x3f   :  { %794 = vmatpush.bf16.msra.mxu3 %v2415_v10  ;;  %v2256_v49 = vld [vmem:[#allocation7 + $0x68] sm:$0xf0]  ;;  %v3198_v50 = vld [vmem:[#allocation7 + $0xe4] sm:$0xf]  ;;  %v2502_v54 = vld [vmem:[#allocation7 + $0x250] sm:$0xf]  ;;  %v2575_v57 = vor.u32 %v3263_v47, %v2574_v45 }
  0x40   :  { %756 = vmatpush.bf16.msra.mxu0 %v2215_v16  ;;  %v2320_v51 = vld [vmem:[#allocation7 + $0xe8] sm:$0xf0]  ;;  %v3245_v55 = vld [vmem:[#allocation7 + $0x254] sm:$0xf0]  ;;  %v2259_v58 = vor.u32 %v3182_v48, %v2256_v49  ;;  %v2566_v59 = vld [vmem:[#allocation7 + $0x2d0] sm:$0xf] }
  0x41   :  { %769 = vmatpush.bf16.msra.mxu1 %v2279_v19  ;;  %v156_v52 = vld [vmem:[#allocation2] sm:$0xff]  ;;  %v3261_v60 = vld [vmem:[#allocation7 + $0x2d4] sm:$0xf0]  ;;  %v3180_v61 = vld [vmem:[#allocation7 + $0x54] sm:$0xf]  ;;  %v2323_v62 = vor.u32 %v3198_v50, %v2320_v51  ;;  %v2503_v6 = vor.u32 %v3245_v55, %v2502_v54  ;;  %s2185_s18 = sshll.u32 %s3887_s11, 4  ;;  %s2186_s18 = int_to_ptr.hbm [resolvable:$true] %s2185_s18 }
  0x42   :  { %782 = vmatpush.bf16.msra.mxu2 %v2343_v20  ;;  %v3802_v56 = vpack.c.bf16 %v156_v52, %v156_v52  ;;  %v2248_v63 = vld [vmem:[#allocation7 + $0x58] sm:$0xf0]  ;;  %v157_v0 = vld [vmem:[#allocation2 + $0x8] sm:$0xff]  ;;  %v2494_v7 = vld [vmem:[#allocation7 + $0x240] sm:$0xf]  ;;  %v2567_v8 = vor.u32 %v3261_v60, %v2566_v59  ;;  %s2174_s22 = sshll.u32 %s3886_s10, 4  ;;  %s2175_s22 = int_to_ptr.hbm [resolvable:$true] %s2174_s22 }
  0x43   :  { %795 = vmatpush.bf16.msra.mxu3 %v2407_v24  ;;  %v158_v1 = vld [vmem:[#allocation2 + $0x10] sm:$0xff]  ;;  %v3196_v2 = vld [vmem:[#allocation7 + $0xd4] sm:$0xf]  ;;  %v3805_v4 = vpack.c.bf16 %v157_v0, %v157_v0  ;;  %v2251_v9 = vor.u32 %v3180_v61, %v2248_v63  ;;  %v3243_v10 = vld [vmem:[#allocation7 + $0x244] sm:$0xf0] }
  0x44   :  { %757 = vmatpush.bf16.msra.mxu0 %v2207_v31  ;;  %v2312_v3 = vld [vmem:[#allocation7 + $0xd8] sm:$0xf0]  ;;  %v3807_v5 = vpack.c.bf16 %v158_v1, %v158_v1  ;;  %v2558_v11 = vld [vmem:[#allocation7 + $0x2c0] sm:$0xf]  ;;  %v3259_v14 = vld [vmem:[#allocation7 + $0x2c4] sm:$0xf0]  ;;  %v2495_v20 = vor.u32 %v3243_v10, %v2494_v7 }
  0x45   :  { %770 = vmatpush.bf16.msra.mxu1 %v2271_v35  ;;  %v159_v12 = vld [vmem:[#allocation2 + $0x18] sm:$0xff]  ;;  %v2315_v13 = vor.u32 %v3196_v2, %v2312_v3  ;;  %v2240_v16 = vld [vmem:[#allocation7 + $0x48] sm:$0xf0]  ;;  %v2559_v21 = vor.u32 %v3259_v14, %v2558_v11  ;;  %v2486_v23 = vld [vmem:[#allocation7 + $0x230] sm:$0xf] }
  0x46   :  { %783 = vmatpush.bf16.msra.mxu2 %v2335_v36  ;;  %v3178_v15 = vld [vmem:[#allocation7 + $0x44] sm:$0xf]  ;;  %v3810_v17 = vpack.c.bf16 %v159_v12, %v159_v12  ;;  %v2304_v19 = vld [vmem:[#allocation7 + $0xc8] sm:$0xf0]  ;;  %v3241_v24 = vld [vmem:[#allocation7 + $0x234] sm:$0xf0] }
  0x47   :  { %796 = vmatpush.bf16.msra.mxu3 %v2399_v39  ;;  %758 = vmatmul.bf16.vlgmr.msra.gmra.mxu0 %v3802_v56  ;;  %v3194_v18 = vld [vmem:[#allocation7 + $0xc4] sm:$0xf]  ;;  %v2243_v22 = vor.u32 %v3178_v15, %v2240_v16  ;;  %v2550_v25 = vld [vmem:[#allocation7 + $0x2b0] sm:$0xf]  ;;  %v3257_v27 = vld [vmem:[#allocation7 + $0x2b4] sm:$0xf0]  ;;  %v2487_v32 = vor.u32 %v3241_v24, %v2486_v23 }
  0x48   :  { %802 = vmatpush.bf16.msrb.mxu0 %v2519_v40  ;;  %771 = vmatmul.bf16.vlgmr.msra.gmra.mxu1 %v3805_v4  ;;  %v2307_v26 = vor.u32 %v3194_v18, %v2304_v19  ;;  %v3176_v28 = vld [vmem:[#allocation7 + $0x34] sm:$0xf]  ;;  %v2232_v29 = vld [vmem:[#allocation7 + $0x38] sm:$0xf0]  ;;  %v2551_v33 = vor.u32 %v3257_v27, %v2550_v25  ;;  %v2478_v35 = vld [vmem:[#allocation7 + $0x220] sm:$0xf] }
  0x49   :  { %815 = vmatpush.bf16.msrb.mxu1 %v2583_v41  ;;  %784 = vmatmul.bf16.vlgmr.msra.gmra.mxu2 %v3807_v5  ;;  %v3192_v30 = vld [vmem:[#allocation7 + $0xb4] sm:$0xf]  ;;  %v2296_v31 = vld [vmem:[#allocation7 + $0xb8] sm:$0xf0]  ;;  %v2235_v34 = vor.u32 %v3176_v28, %v2232_v29  ;;  %v3239_v36 = vld [vmem:[#allocation7 + $0x224] sm:$0xf0] }
  0x4a   :  { %828 = vmatpush.bf16.msrb.mxu2 %v2267_v42  ;;  %797 = vmatmul.bf16.vlgmr.msra.gmra.mxu3 %v3810_v17  ;;  %v2542_v37 = vld [vmem:[#allocation7 + $0x2a0] sm:$0xf]  ;;  %v2299_v38 = vor.u32 %v3192_v30, %v2296_v31  ;;  %v3255_v39 = vld [vmem:[#allocation7 + $0x2a4] sm:$0xf0]  ;;  %v3174_v40 = vld [vmem:[#allocation7 + $0x24] sm:$0xf]  ;;  %v2479_v44 = vor.u32 %v3239_v36, %v2478_v35 }
  0x4b   :  { %841 = vmatpush.bf16.msrb.mxu3 %v2331_v46  ;;  %v2224_v41 = vld [vmem:[#allocation7 + $0x28] sm:$0xf0]  ;;  %v3190_v42 = vld [vmem:[#allocation7 + $0xa4] sm:$0xf]  ;;  %v2543_v45 = vor.u32 %v3255_v39, %v2542_v37  ;;  %v2470_v47 = vld [vmem:[#allocation7 + $0x210] sm:$0xf] }
  0x4c   :  { %803 = vmatpush.bf16.msrb.mxu0 %v2511_v53  ;;  %v2288_v43 = vld [vmem:[#allocation7 + $0xa8] sm:$0xf0]  ;;  %v2227_v46 = vor.u32 %v3174_v40, %v2224_v41  ;;  %v3237_v48 = vld [vmem:[#allocation7 + $0x214] sm:$0xf0]  ;;  %v2534_v49 = vld [vmem:[#allocation7 + $0x290] sm:$0xf] }
  0x4d   :  { %816 = vmatpush.bf16.msrb.mxu1 %v2575_v57  ;;  %v2291_v50 = vor.u32 %v3190_v42, %v2288_v43  ;;  %v3253_v51 = vld [vmem:[#allocation7 + $0x294] sm:$0xf0]  ;;  %v3172_v52 = vld [vmem:[#allocation7 + $0x14] sm:$0xf]  ;;  %v2216_v53 = vld [vmem:[#allocation7 + $0x18] sm:$0xf0]  ;;  %v2471_v57 = vor.u32 %v3237_v48, %v2470_v47 }
  0x4e   :  { %829 = vmatpush.bf16.msrb.mxu2 %v2259_v58  ;;  %v3188_v54 = vld [vmem:[#allocation7 + $0x94] sm:$0xf]  ;;  %v2280_v55 = vld [vmem:[#allocation7 + $0x98] sm:$0xf0]  ;;  %v2462_v58 = vld [vmem:[#allocation7 + $0x200] sm:$0xf]  ;;  %v2535_v60 = vor.u32 %v3253_v51, %v2534_v49  ;;  %v2219_v61 = vor.u32 %v3172_v52, %v2216_v53 }
  0x4f   :  { %842 = vmatpush.bf16.msrb.mxu3 %v2323_v62  ;;  %v3235_v59 = vld [vmem:[#allocation7 + $0x204] sm:$0xf0]  ;;  %v2526_v62 = vld [vmem:[#allocation7 + $0x280] sm:$0xf]  ;;  %v3170_v0 = vld [vmem:[#allocation7 + $0x4] sm:$0xf]  ;;  %v2283_v1 = vor.u32 %v3188_v54, %v2280_v55 }
  0x50   :  { %804 = vmatpush.bf16.msrb.mxu0 %v2503_v6  ;;  %v3251_v63 = vld [vmem:[#allocation7 + $0x284] sm:$0xf0]  ;;  %v2208_v2 = vld [vmem:[#allocation7 + $0x8] sm:$0xf0]  ;;  %v3186_v3 = vld [vmem:[#allocation7 + $0x84] sm:$0xf]  ;;  %v2463_v10 = vor.u32 %v3235_v59, %v2462_v58 }
  0x51   :  { %817 = vmatpush.bf16.msrb.mxu1 %v2567_v8  ;;  %v2272_v6 = vld [vmem:[#allocation7 + $0x88] sm:$0xf0]  ;;  %v3216_v7 = vld [vmem:[#allocation7 + $0x174] sm:$0xf]  ;;  %v2392_v8 = vld [vmem:[#allocation7 + $0x178] sm:$0xf0]  ;;  %v2527_v14 = vor.u32 %v3251_v63, %v2526_v62  ;;  %v2211_v15 = vor.u32 %v3170_v0, %v2208_v2 }
  0x52   :  { %830 = vmatpush.bf16.msrb.mxu2 %v2251_v9  ;;  %v3232_v9 = vld [vmem:[#allocation7 + $0x1f4] sm:$0xf]  ;;  %v2456_v11 = vld [vmem:[#allocation7 + $0x1f8] sm:$0xf0]  ;;  %v160_v19 = vld [vmem:[#allocation2 + $0x20] sm:$0xff] }
  0x53   :  { %843 = vmatpush.bf16.msrb.mxu3 %v2315_v13  ;;  %v3248_v12 = vld [vmem:[#allocation7 + $0x274] sm:$0xf]  ;;  %v2520_v13 = vld [vmem:[#allocation7 + $0x278] sm:$0xf0]  ;;  %v2459_v23 = vor.u32 %v3232_v9, %v2456_v11  ;;  %v3214_v25 = vld [vmem:[#allocation7 + $0x164] sm:$0xf]  ;;  %v3814_v29 = vpack.c.bf16 %v160_v19, %v160_v19 }
  0x54   :  { %805 = vmatpush.bf16.msrb.mxu0 %v2495_v20  ;;  %v3264_v16 = vld [vmem:[#allocation7 + $0x2f4] sm:$0xf]  ;;  %v2584_v18 = vld [vmem:[#allocation7 + $0x2f8] sm:$0xf0]  ;;  %v2275_v20 = vor.u32 %v3186_v3, %v2272_v6  ;;  %v2523_v24 = vor.u32 %v3248_v12, %v2520_v13  ;;  %v3230_v27 = vld [vmem:[#allocation7 + $0x1e4] sm:$0xf] }
  0x55   :  { %818 = vmatpush.bf16.msrb.mxu1 %v2559_v21  ;;  %v2395_v21 = vor.u32 %v3216_v7, %v2392_v8  ;;  %v2587_v28 = vor.u32 %v3264_v16, %v2584_v18  ;;  %v2448_v30 = vld [vmem:[#allocation7 + $0x1e8] sm:$0xf0]  ;;  %v3246_v31 = vld [vmem:[#allocation7 + $0x264] sm:$0xf]  ;;  %v3212_v39 = vld [vmem:[#allocation7 + $0x154] sm:$0xf] }
  0x56   :  { %831 = vmatpush.bf16.msrb.mxu2 %v2243_v22  ;;  %v161_v22 = vld [vmem:[#allocation2 + $0x28] sm:$0xff]  ;;  %v2576_v35 = vld [vmem:[#allocation7 + $0x2e8] sm:$0xf0]  ;;  %v2451_v37 = vor.u32 %v3230_v27, %v2448_v30  ;;  %v2376_v40 = vld [vmem:[#allocation7 + $0x158] sm:$0xf0] }
  0x57   :  { %844 = vmatpush.bf16.msrb.mxu3 %v2307_v26  ;;  %v2384_v26 = vld [vmem:[#allocation7 + $0x168] sm:$0xf0]  ;;  %v3228_v41 = vld [vmem:[#allocation7 + $0x1d4] sm:$0xf]  ;;  %v2440_v43 = vld [vmem:[#allocation7 + $0x1d8] sm:$0xf0]  ;;  %v2379_v48 = vor.u32 %v3212_v39, %v2376_v40 }
  0x58   :  { %806 = vmatpush.bf16.msrb.mxu0 %v2487_v32  ;;  %v2512_v32 = vld [vmem:[#allocation7 + $0x268] sm:$0xf0]  ;;  %v2387_v36 = vor.u32 %v3214_v25, %v2384_v26  ;;  %v2568_v47 = vld [vmem:[#allocation7 + $0x2d8] sm:$0xf0]  ;;  %v2443_v49 = vor.u32 %v3228_v41, %v2440_v43  ;;  %v3210_v51 = vld [vmem:[#allocation7 + $0x144] sm:$0xf] }
  0x59   :  { %819 = vmatpush.bf16.msrb.mxu1 %v2551_v33  ;;  %v3816_v33 = vpack.c.bf16 %v161_v22, %v161_v22  ;;  %v2368_v52 = vld [vmem:[#allocation7 + $0x148] sm:$0xf0]  ;;  %v3226_v53 = vld [vmem:[#allocation7 + $0x1c4] sm:$0xf]  ;;  %v3208_v62 = vld [vmem:[#allocation7 + $0x134] sm:$0xf] }
  0x5a   :  { %832 = vmatpush.bf16.msrb.mxu2 %v2235_v34  ;;  %v3262_v34 = vld [vmem:[#allocation7 + $0x2e4] sm:$0xf]  ;;  %v2432_v55 = vld [vmem:[#allocation7 + $0x1c8] sm:$0xf0]  ;;  %v2360_v63 = vld [vmem:[#allocation7 + $0x138] sm:$0xf0] }
  0x5b   :  { %845 = vmatpush.bf16.msrb.mxu3 %v2299_v38  ;;  %v2515_v38 = vor.u32 %v3246_v31, %v2512_v32  ;;  %v2579_v42 = vor.u32 %v3262_v34, %v2576_v35  ;;  %v2496_v58 = vld [vmem:[#allocation7 + $0x248] sm:$0xf0]  ;;  %v3258_v59 = vld [vmem:[#allocation7 + $0x2c4] sm:$0xf]  ;;  %v3224_v0 = vld [vmem:[#allocation7 + $0x1b4] sm:$0xf]  ;;  %v2363_v9 = vor.u32 %v3208_v62, %v2360_v63 }
  0x5c   :  { %807 = vmatpush.bf16.msrb.mxu0 %v2479_v44  ;;  %v3244_v44 = vld [vmem:[#allocation7 + $0x254] sm:$0xf]  ;;  %v2424_v2 = vld [vmem:[#allocation7 + $0x1b8] sm:$0xf0]  ;;  %v3206_v12 = vld [vmem:[#allocation7 + $0x124] sm:$0xf] }
  0x5d   :  { %820 = vmatpush.bf16.msrb.mxu1 %v2543_v45  ;;  %v2504_v45 = vld [vmem:[#allocation7 + $0x258] sm:$0xf0]  ;;  %v3240_v3 = vld [vmem:[#allocation7 + $0x234] sm:$0xf]  ;;  %v2352_v13 = vld [vmem:[#allocation7 + $0x128] sm:$0xf0] }
  0x5e   :  { %833 = vmatpush.bf16.msrb.mxu2 %v2227_v46  ;;  %v3260_v46 = vld [vmem:[#allocation7 + $0x2d4] sm:$0xf]  ;;  %v2488_v6 = vld [vmem:[#allocation7 + $0x238] sm:$0xf0]  ;;  %v2416_v16 = vld [vmem:[#allocation7 + $0x1a8] sm:$0xf0]  ;;  %v2355_v22 = vor.u32 %v3206_v12, %v2352_v13 }
  0x5f   :  { %846 = vmatpush.bf16.msrb.mxu3 %v2291_v50  ;;  %v2507_v50 = vor.u32 %v3244_v44, %v2504_v45  ;;  %v2571_v54 = vor.u32 %v3260_v46, %v2568_v47  ;;  %v3256_v7 = vld [vmem:[#allocation7 + $0x2b4] sm:$0xf]  ;;  %v2552_v8 = vld [vmem:[#allocation7 + $0x2b8] sm:$0xf0]  ;;  %v2491_v11 = vor.u32 %v3240_v3, %v2488_v6  ;;  %v3238_v18 = vld [vmem:[#allocation7 + $0x224] sm:$0xf] }
  0x60   :  { %808 = vmatpush.bf16.msrb.mxu0 %v2471_v57  ;;  %v3242_v57 = vld [vmem:[#allocation7 + $0x244] sm:$0xf]  ;;  %v2480_v19 = vld [vmem:[#allocation7 + $0x228] sm:$0xf0]  ;;  %v3204_v25 = vld [vmem:[#allocation7 + $0x114] sm:$0xf] }
  0x61   :  { %821 = vmatpush.bf16.msrb.mxu1 %v2535_v60  ;;  %v2371_v60 = vor.u32 %v3210_v51, %v2368_v52  ;;  %v2344_v26 = vld [vmem:[#allocation7 + $0x118] sm:$0xf0]  ;;  %v3220_v27 = vld [vmem:[#allocation7 + $0x194] sm:$0xf]  ;;  %v2336_v40 = vld [vmem:[#allocation7 + $0x108] sm:$0xf0] }
  0x62   :  { %834 = vmatpush.bf16.msrb.mxu2 %v2219_v61  ;;  %v2435_v61 = vor.u32 %v3226_v53, %v2432_v55  ;;  %v2408_v30 = vld [vmem:[#allocation7 + $0x198] sm:$0xf0]  ;;  %v3236_v31 = vld [vmem:[#allocation7 + $0x214] sm:$0xf]  ;;  %v3218_v41 = vld [vmem:[#allocation7 + $0x184] sm:$0xf] }
  0x63   :  { %847 = vmatpush.bf16.msrb.mxu3 %v2283_v1  ;;  %v2472_v32 = vld [vmem:[#allocation7 + $0x218] sm:$0xf0]  ;;  %v3252_v34 = vld [vmem:[#allocation7 + $0x294] sm:$0xf]  ;;  %v3234_v44 = vld [vmem:[#allocation7 + $0x204] sm:$0xf] }
  0x64   :  { %809 = vmatpush.bf16.msrb.mxu0 %v2463_v10  ;;  %v2427_v10 = vor.u32 %v3224_v0, %v2424_v2  ;;  %v2536_v35 = vld [vmem:[#allocation7 + $0x298] sm:$0xf0]  ;;  %v2475_v39 = vor.u32 %v3236_v31, %v2472_v32  ;;  %v2464_v45 = vld [vmem:[#allocation7 + $0x208] sm:$0xf0]  ;;  %v3250_v46 = vld [vmem:[#allocation7 + $0x284] sm:$0xf] }
  0x65   :  { %822 = vmatpush.bf16.msrb.mxu1 %v2527_v14  ;;  %v3222_v14 = vld [vmem:[#allocation7 + $0x1a4] sm:$0xf]  ;;  %v2539_v43 = vor.u32 %v3252_v34, %v2536_v35  ;;  %v2528_v47 = vld [vmem:[#allocation7 + $0x288] sm:$0xf0]  ;;  %v3280_v51 = vld [vmem:[#allocation8 + $0x74] sm:$0xf] }
  0x66   :  { %835 = vmatpush.bf16.msrb.mxu2 %v2211_v15  ;;  %v2555_v15 = vor.u32 %v3256_v7, %v2552_v8  ;;  %v2648_v52 = vld [vmem:[#allocation8 + $0x78] sm:$0xf0]  ;;  %v2531_v55 = vor.u32 %v3250_v46, %v2528_v47  ;;  %v2630_v63 = vld [vmem:[#allocation8 + $0x50] sm:$0xf]  ;;  %v3277_v0 = vld [vmem:[#allocation8 + $0x54] sm:$0xf0] }
  0x67   :  { %848 = vmatpush.bf16.msrb.mxu3 %v2275_v20  ;;  %810 = vmatmul.bf16.vlgmr.msrb.gmra.mxu0 %v3814_v29  ;;  %v3254_v20 = vld [vmem:[#allocation7 + $0x2a4] sm:$0xf]  ;;  %v2631_v2 = vor.u32 %v3277_v0, %v2630_v63  ;;  %v2632_v3 = vld [vmem:[#allocation8 + $0x58] sm:$0xf0]  ;;  %v2622_v6 = vld [vmem:[#allocation8 + $0x40] sm:$0xf] }
  0x68   :  { %854 = vmatpush.bf16.msra.mxu0 %v2395_v21  ;;  %823 = vmatmul.bf16.vlgmr.msrb.gmra.mxu1 %v3816_v33  ;;  %v2544_v21 = vld [vmem:[#allocation7 + $0x2a8] sm:$0xf0]  ;;  %v3275_v7 = vld [vmem:[#allocation8 + $0x44] sm:$0xf0]  ;;  %v2616_v13 = vld [vmem:[#allocation8 + $0x38] sm:$0xf0] }
  0x69   :  { %867 = vmatpush.bf16.msra.mxu1 %v2459_v23  ;;  %836 = vmatmul.bf16.vlgmr.msrb.gmra.mxu2 %v3802_v56  ;;  %v2560_v56 = vld [vmem:[#allocation7 + $0x2c8] sm:$0xf0]  ;;  %v2419_v23 = vor.u32 %v3222_v14, %v2416_v16  ;;  %v3271_v16 = vld [vmem:[#allocation8 + $0x24] sm:$0xf0]  ;;  %v3266_v32 = vld [vmem:[#allocation8 + $0x4] sm:$0xf] }
  0x6a   :  { %880 = vmatpush.bf16.msra.mxu2 %v2523_v24  ;;  %849 = vmatmul.bf16.vlgmr.msrb.gmra.mxu3 %v3805_v4  ;;  %v2499_v4 = vor.u32 %v3242_v57, %v2496_v58  ;;  %v2563_v1 = vor.u32 %v3258_v59, %v2560_v56  ;;  %v2483_v24 = vor.u32 %v3238_v18, %v2480_v19  ;;  %v2638_v59 = vld [vmem:[#allocation8 + $0x60] sm:$0xf]  ;;  %v3279_v56 = vld [vmem:[#allocation8 + $0x64] sm:$0xf0]  ;;  %v3270_v18 = vld [vmem:[#allocation8 + $0x24] sm:$0xf] }
  0x6b   :  { %893 = vmatpush.bf16.msra.mxu3 %v2587_v28  ;;  %v2547_v28 = vor.u32 %v3254_v20, %v2544_v21  ;;  %v2651_v58 = vor.u32 %v3280_v51, %v2648_v52  ;;  %v2608_v19 = vld [vmem:[#allocation8 + $0x28] sm:$0xf0]  ;;  %v3267_v31 = vld [vmem:[#allocation8 + $0x4] sm:$0xf0]  ;;  %v3290_v0 = vld [vmem:[#allocation8 + $0xc4] sm:$0xf] }
  0x6c   :  { %855 = vmatpush.bf16.msra.mxu0 %v2387_v36  ;;  %v2347_v36 = vor.u32 %v3204_v25, %v2344_v26  ;;  %v2611_v21 = vor.u32 %v3270_v18, %v2608_v19  ;;  %v3295_v46 = vld [vmem:[#allocation8 + $0xe4] sm:$0xf0] }
  0x6d   :  { %868 = vmatpush.bf16.msra.mxu1 %v2451_v37  ;;  %v3202_v37 = vld [vmem:[#allocation7 + $0x104] sm:$0xf]  ;;  %v3291_v63 = vld [vmem:[#allocation8 + $0xc4] sm:$0xf0] }
  0x6e   :  { %881 = vmatpush.bf16.msra.mxu2 %v2515_v38  ;;  %v2411_v38 = vor.u32 %v3220_v27, %v2408_v30  ;;  %v2600_v27 = vld [vmem:[#allocation8 + $0x18] sm:$0xf0]  ;;  %v2590_v30 = vld [vmem:[#allocation8] sm:$0xf] }
  0x6f   :  { %894 = vmatpush.bf16.msra.mxu3 %v2579_v42  ;;  %v2400_v42 = vld [vmem:[#allocation7 + $0x188] sm:$0xf0]  ;;  %v2591_v35 = vor.u32 %v3267_v31, %v2590_v30  ;;  %v2664_v30 = vld [vmem:[#allocation8 + $0x98] sm:$0xf0] }
  0x70   :  { %856 = vmatpush.bf16.msra.mxu0 %v2379_v48  ;;  %v2646_v48 = vld [vmem:[#allocation8 + $0x70] sm:$0xf]  ;;  %v2403_v53 = vor.u32 %v3218_v41, %v2400_v42  ;;  %v3297_v41 = vld [vmem:[#allocation8 + $0xf4] sm:$0xf0]  ;;  %v3296_v42 = vld [vmem:[#allocation8 + $0xf4] sm:$0xf] }
  0x71   :  { %869 = vmatpush.bf16.msra.mxu1 %v2443_v49  ;;  %v3281_v49 = vld [vmem:[#allocation8 + $0x74] sm:$0xf0] }
  0x72   :  { %882 = vmatpush.bf16.msra.mxu2 %v2507_v50  ;;  %v2339_v50 = vor.u32 %v3202_v37, %v2336_v40  ;;  %v2647_v57 = vor.u32 %v3281_v49, %v2646_v48  ;;  %v2710_v40 = vld [vmem:[#allocation8 + $0xf0] sm:$0xf]  ;;  %v3294_v48 = vld [vmem:[#allocation8 + $0xe4] sm:$0xf]  ;;  %v2704_v49 = vld [vmem:[#allocation8 + $0xe8] sm:$0xf0] }
  0x73   :  { %895 = vmatpush.bf16.msra.mxu3 %v2571_v54  ;;  %v2467_v54 = vor.u32 %v3234_v44, %v2464_v45  ;;  %v2712_v44 = vld [vmem:[#allocation8 + $0xf8] sm:$0xf0]  ;;  %v2702_v45 = vld [vmem:[#allocation8 + $0xe0] sm:$0xf] }
  0x74   :  { %857 = vmatpush.bf16.msra.mxu0 %v2371_v60  ;;  %v3278_v60 = vld [vmem:[#allocation8 + $0x64] sm:$0xf]  ;;  %v2715_v47 = vor.u32 %v3296_v42, %v2712_v44  ;;  %v2703_v52 = vor.u32 %v3295_v46, %v2702_v45 }
  0x75   :  { %870 = vmatpush.bf16.msra.mxu1 %v2435_v61  ;;  %v2640_v61 = vld [vmem:[#allocation8 + $0x68] sm:$0xf0] }
  0x76   :  { %883 = vmatpush.bf16.msra.mxu2 %v2499_v4  ;;  %v2639_v4 = vor.u32 %v3279_v56, %v2638_v59  ;;  %v2643_v62 = vor.u32 %v3278_v60, %v2640_v61  ;;  %v3292_v59 = vld [vmem:[#allocation8 + $0xd4] sm:$0xf]  ;;  %v2696_v61 = vld [vmem:[#allocation8 + $0xd8] sm:$0xf0] }
  0x77   :  { %896 = vmatpush.bf16.msra.mxu3 %v2563_v1  ;;  %v3276_v1 = vld [vmem:[#allocation8 + $0x54] sm:$0xf] }
  0x78   :  { %858 = vmatpush.bf16.msra.mxu0 %v2363_v9  ;;  %v2635_v8 = vor.u32 %v3276_v1, %v2632_v3  ;;  %v3274_v9 = vld [vmem:[#allocation8 + $0x44] sm:$0xf]  ;;  %v2688_v1 = vld [vmem:[#allocation8 + $0xc8] sm:$0xf0] }
  0x79   :  { %871 = vmatpush.bf16.msra.mxu1 %v2427_v10  ;;  %v2623_v10 = vor.u32 %v3275_v7, %v2622_v6 }
  0x7a   :  { %884 = vmatpush.bf16.msra.mxu2 %v2491_v11  ;;  %v3273_v11 = vld [vmem:[#allocation8 + $0x34] sm:$0xf0] }
  0x7b   :  { %897 = vmatpush.bf16.msra.mxu3 %v2555_v15  ;;  %v2606_v15 = vld [vmem:[#allocation8 + $0x20] sm:$0xf] }
  0x7c   :  { %859 = vmatpush.bf16.msra.mxu0 %v2355_v22  ;;  %v2607_v20 = vor.u32 %v3271_v16, %v2606_v15  ;;  %v2598_v22 = vld [vmem:[#allocation8 + $0x10] sm:$0xf]  ;;  %v3287_v15 = vld [vmem:[#allocation8 + $0xa4] sm:$0xf0]  ;;  %v3286_v16 = vld [vmem:[#allocation8 + $0xa4] sm:$0xf] }
  0x7d   :  { %872 = vmatpush.bf16.msra.mxu1 %v2419_v23  ;;  %v3269_v23 = vld [vmem:[#allocation8 + $0x14] sm:$0xf0] }
  0x7e   :  { %885 = vmatpush.bf16.msra.mxu2 %v2483_v24  ;;  %v3268_v24 = vld [vmem:[#allocation8 + $0x14] sm:$0xf]  ;;  %v2599_v26 = vor.u32 %v3269_v23, %v2598_v22 }
  0x7f   :  { %898 = vmatpush.bf16.msra.mxu3 %v2547_v28  ;;  %v2603_v28 = vor.u32 %v3268_v24, %v2600_v27  ;;  %v2662_v24 = vld [vmem:[#allocation8 + $0x90] sm:$0xf] }
  0x80   :  { %860 = vmatpush.bf16.msra.mxu0 %v2347_v36  ;;  %v2592_v36 = vld [vmem:[#allocation8 + $0x8] sm:$0xf0] }
  0x81   :  { %873 = vmatpush.bf16.msra.mxu1 %v2411_v38  ;;  %v2595_v37 = vor.u32 %v3266_v32, %v2592_v36  ;;  %v3829_v38 = vld [vmem:[%s3879_s3] sm:$0x3]  ;;  %s3716_s3 = smov [#allocation17]  }
  0x82   :  { %886 = vmatpush.bf16.msra.mxu2 %v2475_v39  ;;  %s2183_s16 = sshll.u32 %s3716_s3, 4  ;;  %s2184_s16 = int_to_ptr.vmem [resolvable:$true] %s2183_s16 }
  0x83   :  { %899 = vmatpush.bf16.msra.mxu3 %v2539_v43  ;;  %v2711_v43 = vor.u32 %v3297_v41, %v2710_v40  ;;  %v3282_v40 = vld [vmem:[#allocation8 + $0x84] sm:$0xf] }
  0x84   :  { %861 = vmatpush.bf16.msra.mxu0 %v2339_v50  ;;  %v266_v50 = vperm.slane %v3829_v38, 0 }
  0x85   :  { %874 = vmatpush.bf16.msra.mxu1 %v2403_v53 }
  0x86   :  { %887 = vmatpush.bf16.msra.mxu2 %v2467_v54 }
  0x87   :  { %900 = vmatpush.bf16.msra.mxu3 %v2531_v55  ;;  %862 = vmatmul.bf16.vlgmr.msra.gmra.mxu0 %v3807_v5  ;;  %v2624_v5 = vld [vmem:[#allocation8 + $0x48] sm:$0xf0]  ;;  %v2707_v55 = vor.u32 %v3294_v48, %v2704_v49 }
  0x88   :  { %1108 = vmatpush.bf16.msrb.mxu0 %v2647_v57  ;;  %875 = vmatmul.bf16.vlgmr.msra.gmra.mxu1 %v3810_v17  ;;  %v2627_v17 = vor.u32 %v3274_v9, %v2624_v5  ;;  %v2694_v57 = vld [vmem:[#allocation8 + $0xd0] sm:$0xf] }
  0x89   :  { %888 = vmatmul.bf16.vlgmr.msra.gmra.mxu2 %v3814_v29  ;;  %v2614_v29 = vld [vmem:[#allocation8 + $0x30] sm:$0xf]  ;;  %1121 = vmatpush.bf16.msrb.mxu1 %v2711_v43  ;;  %v2656_v43 = vld [vmem:[#allocation8 + $0x88] sm:$0xf0] }
  0x8a   :  { %1134 = vmatpush.bf16.msrb.mxu2 %v2651_v58  ;;  %901 = vmatmul.bf16.vlgmr.msra.gmra.mxu3 %v3816_v33  ;;  %v3272_v33 = vld [vmem:[#allocation8 + $0x34] sm:$0xf]  ;;  %v2615_v12 = vor.u32 %v3273_v11, %v2614_v29  ;;  %v3293_v58 = vld [vmem:[#allocation8 + $0xd4] sm:$0xf0]  ;;  %v2678_v5 = vld [vmem:[#allocation8 + $0xb0] sm:$0xf]  ;;  %v2659_v44 = vor.u32 %v3282_v40, %v2656_v43 }
  0x8b   :  { %v2619_v14 = vor.u32 %v3272_v33, %v2616_v13  ;;  %1147 = vmatpush.bf16.msrb.mxu3 %v2715_v47  ;;  %v2695_v60 = vor.u32 %v3293_v58, %v2694_v57  ;;  %v2680_v33 = vld [vmem:[#allocation8 + $0xb8] sm:$0xf0]  ;;  %v267_v47 = vperm.slane %v3829_v38, 1 }
  0x8c   :  { %1109 = vmatpush.bf16.msrb.mxu0 %v2639_v4  ;;  %v2699_v4 = vor.u32 %v3292_v59, %v2696_v61  ;;  %v3313_v38 = vld [vmem:[#allocation11 + $0x74] sm:$0xf0]  ;;  %v2728_v43 = vld [vmem:[#allocation11 + $0x18] sm:$0xf0] }
  0x8d   :  { %1122 = vmatpush.bf16.msrb.mxu1 %v2703_v52  ;;  %v3301_v40 = vld [vmem:[#allocation11 + $0x14] sm:$0xf0] }
  0x8e   :  { %1135 = vmatpush.bf16.msrb.mxu2 %v2643_v62  ;;  %v2686_v62 = vld [vmem:[#allocation8 + $0xc0] sm:$0xf] }
  0x8f   :  { %1148 = vmatpush.bf16.msrb.mxu3 %v2707_v55  ;;  %v2687_v6 = vor.u32 %v3291_v63, %v2686_v62  ;;  %v2774_v63 = vld [vmem:[#allocation11 + $0x70] sm:$0xf] }
  0x90   :  { %1110 = vmatpush.bf16.msrb.mxu0 %v2631_v2 }
  0x91   :  { %1123 = vmatpush.bf16.msrb.mxu1 %v2695_v60 }
  0x92   :  { %1136 = vmatpush.bf16.msrb.mxu2 %v2635_v8  ;;  %v2691_v8 = vor.u32 %v3290_v0, %v2688_v1  ;;  %v3312_v0 = vld [vmem:[#allocation11 + $0x74] sm:$0xf]  ;;  %v2775_v1 = vor.u32 %v3313_v38, %v2774_v63  ;;  %v3144_v38 = vld [vmem:[#allocation14 + $0x2e8] sm:$0xf0] }
  0x93   :  { %1149 = vmatpush.bf16.msrb.mxu3 %v2699_v4  ;;  %v3404_v63 = vld [vmem:[#allocation14 + $0x2d4] sm:$0xf] }
  0x94   :  { %1111 = vmatpush.bf16.msrb.mxu0 %v2623_v10  ;;  %v3289_v10 = vld [vmem:[#allocation8 + $0xb4] sm:$0xf0] }
  0x95   :  { %1124 = vmatpush.bf16.msrb.mxu1 %v2687_v6  ;;  %v2679_v11 = vor.u32 %v3289_v10, %v2678_v5  ;;  %v3311_v6 = vld [vmem:[#allocation11 + $0x64] sm:$0xf0] }
  0x96   :  { %1137 = vmatpush.bf16.msrb.mxu2 %v2627_v17  ;;  %v3288_v17 = vld [vmem:[#allocation8 + $0xb4] sm:$0xf] }
  0x97   :  { %1150 = vmatpush.bf16.msrb.mxu3 %v2691_v8  ;;  %v3310_v8 = vld [vmem:[#allocation11 + $0x64] sm:$0xf] }
  0x98   :  { %1112 = vmatpush.bf16.msrb.mxu0 %v2615_v12  ;;  %v2683_v12 = vor.u32 %v3288_v17, %v2680_v33  ;;  %v3308_v33 = vld [vmem:[#allocation11 + $0x54] sm:$0xf] }
  0x99   :  { %1125 = vmatpush.bf16.msrb.mxu1 %v2679_v11  ;;  %v3309_v11 = vld [vmem:[#allocation11 + $0x54] sm:$0xf0] }
  0x9a   :  { %1138 = vmatpush.bf16.msrb.mxu2 %v2619_v14  ;;  %v2670_v14 = vld [vmem:[#allocation8 + $0xa0] sm:$0xf] }
  0x9b   :  { %1151 = vmatpush.bf16.msrb.mxu3 %v2683_v12 }
  0x9c   :  { %1113 = vmatpush.bf16.msrb.mxu0 %v2607_v20  ;;  %v2671_v20 = vor.u32 %v3287_v15, %v2670_v14  ;;  %v2760_v14 = vld [vmem:[#allocation11 + $0x58] sm:$0xf0] }
  0x9d   :  { %v2763_v15 = vor.u32 %v3308_v33, %v2760_v14  ;;  %v3120_v33 = vld [vmem:[#allocation14 + $0x2b8] sm:$0xf0]  ;;  %v3347_v14 = vld [vmem:[#allocation14 + $0x104] sm:$0xf0] }
  0x9e   :  { %1139 = vmatpush.bf16.msrb.mxu2 %v2611_v21  ;;  %v2672_v21 = vld [vmem:[#allocation8 + $0xa8] sm:$0xf0]  ;;  %1126 = vmatpush.bf16.msrb.mxu1 %v2671_v20  ;;  %v3306_v20 = vld [vmem:[#allocation11 + $0x44] sm:$0xf] }
  0x9f   :  { %v2675_v22 = vor.u32 %v3286_v16, %v2672_v21 }
  0xa0   :  { %1114 = vmatpush.bf16.msrb.mxu0 %v2599_v26  ;;  %v3284_v26 = vld [vmem:[#allocation8 + $0x94] sm:$0xf] }
  0xa1   :  { %1152 = vmatpush.bf16.msrb.mxu3 %v2675_v22  ;;  %v2667_v31 = vor.u32 %v3284_v26, %v2664_v30  ;;  %v2752_v22 = vld [vmem:[#allocation11 + $0x48] sm:$0xf0]  ;;  %v3304_v26 = vld [vmem:[#allocation11 + $0x34] sm:$0xf]  ;;  %v2744_v30 = vld [vmem:[#allocation11 + $0x38] sm:$0xf0] }
  0xa2   :  { %1140 = vmatpush.bf16.msrb.mxu2 %v2603_v28 }
  0xa4   :  { %1115 = vmatpush.bf16.msrb.mxu0 %v2591_v35 }
  0xa5   :  { %1153 = vmatpush.bf16.msrb.mxu3 %v2667_v31  ;;  %v2747_v31 = vor.u32 %v3304_v26, %v2744_v30  ;;  %v3070_v30 = vld [vmem:[#allocation14 + $0x240] sm:$0xf] }
  0xa6   :  { %1141 = vmatpush.bf16.msrb.mxu2 %v2595_v37  ;;  %v2654_v37 = vld [vmem:[#allocation8 + $0x80] sm:$0xf] }
  0xa8   :  { %1269 = vmatpush.bf16.msra.mxu0 %v2775_v1  ;;  %v3147_v1 = vor.u32 %v3404_v63, %v3144_v38  ;;  %v3326_v63 = vld [vmem:[#allocation14 + $0x64] sm:$0xf]  ;;  %v2832_v38 = vld [vmem:[#allocation14 + $0x78] sm:$0xf0] }
  0xa9   :  { %1154 = vmatpush.bf16.msrb.mxu3 %v2659_v44 }
  0xc4   :  { %v759_v25 = vpop.f32.mrf.mxu0 }
  0xc5   :  { %v772_v34 = vpop.f32.mrf.mxu1  ;;  %v760_v56 = vadd.f32 %v759_v25, %v266_v50  ;;  %v3285_v25 = vld [vmem:[#allocation8 + $0x94] sm:$0xf0] }
  0xc6   :  { %v2663_v28 = vor.u32 %v3285_v25, %v2662_v24  ;;  %v2742_v24 = vld [vmem:[#allocation11 + $0x30] sm:$0xf]  ;;  %v3305_v25 = vld [vmem:[#allocation11 + $0x34] sm:$0xf0] }
  0xc7   :  { %v773_v2 = vadd.f32 %v772_v34, %v760_v56 }
  0xc8   :  { %1127 = vmatpush.bf16.msrb.mxu1 %v2663_v28  ;;  %v2743_v28 = vor.u32 %v3305_v25, %v2742_v24  ;;  %v3392_v24 = vld [vmem:[#allocation14 + $0x274] sm:$0xf]  ;;  %v3096_v25 = vld [vmem:[#allocation14 + $0x288] sm:$0xf0] }
  0xcc   :  { %v761_v39 = vpop.f32.mrf.mxu0  ;;  %v785_v51 = vpop.f32.mrf.mxu2 }
  0xcd   :  { %v774_v53 = vpop.f32.mrf.mxu1  ;;  %v798_v54 = vpop.f32.mrf.mxu3  ;;  %v786_v9 = vadd.f32 %v785_v51, %v773_v2  ;;  %v3283_v39 = vld [vmem:[#allocation8 + $0x84] sm:$0xf0]  ;;  %v2776_v2 = vld [vmem:[#allocation11 + $0x78] sm:$0xf0] }
  0xce   :  { %v2655_v42 = vor.u32 %v3283_v39, %v2654_v37  ;;  %v2736_v37 = vld [vmem:[#allocation11 + $0x28] sm:$0xf0]  ;;  %v2726_v39 = vld [vmem:[#allocation11 + $0x10] sm:$0xf] }
  0xcf   :  { %v799_v29 = vadd.f32 %v798_v54, %v786_v9  ;;  %v2768_v9 = vld [vmem:[#allocation11 + $0x68] sm:$0xf0]  ;;  %v2727_v44 = vor.u32 %v3301_v40, %v2726_v39 }
  0xd0   :  { %1128 = vmatpush.bf16.msrb.mxu1 %v2655_v42  ;;  %v2771_v10 = vor.u32 %v3310_v8, %v2768_v9  ;;  %v3300_v42 = vld [vmem:[#allocation11 + $0x14] sm:$0xf]  ;;  %v3350_v9 = vld [vmem:[#allocation14 + $0x124] sm:$0xf] }
  0xd4   :  { %v787_v3 = vpop.f32.mrf.mxu2 }
  0xd5   :  { %v800_v7 = vpop.f32.mrf.mxu3  ;;  %v2766_v3 = vld [vmem:[#allocation11 + $0x60] sm:$0xf] }
  0xd6   :  { %v2779_v7 = vor.u32 %v3312_v0, %v2776_v2  ;;  %v2767_v5 = vor.u32 %v3311_v6, %v2766_v3  ;;  %v2926_v0 = vld [vmem:[#allocation14 + $0x120] sm:$0xf]  ;;  %v3353_v2 = vld [vmem:[#allocation14 + $0x134] sm:$0xf0] }
  0xd7   :  { %v3118_v3 = vld [vmem:[#allocation14 + $0x2a0] sm:$0xf]  ;;  %v3401_v6 = vld [vmem:[#allocation14 + $0x2b4] sm:$0xf0] }
  0xd8   :  { %1282 = vmatpush.bf16.msra.mxu1 %v2779_v7  ;;  %1270 = vmatpush.bf16.msra.mxu0 %v2767_v5  ;;  %v2927_v7 = vor.u32 %v3353_v2, %v2926_v0  ;;  %v3119_v8 = vor.u32 %v3401_v6, %v3118_v3  ;;  %v2928_v5 = vld [vmem:[#allocation14 + $0x138] sm:$0xf0]  ;;  %v3374_v0 = vld [vmem:[#allocation14 + $0x1e4] sm:$0xf] }
  0xdc   :  { %1283 = vmatpush.bf16.msra.mxu1 %v2771_v10  ;;  %v3398_v10 = vld [vmem:[#allocation14 + $0x2a4] sm:$0xf] }
  0xe0   :  { %1284 = vmatpush.bf16.msra.mxu1 %v2763_v15 }
  0xe4   :  { %v811_v13 = vpop.f32.mrf.mxu0 }
  0xe5   :  { %v812_v18 = vadd.f32 %v811_v13, %v799_v29  ;;  %v824_v19 = vpop.f32.mrf.mxu1  ;;  %v2758_v29 = vld [vmem:[#allocation11 + $0x50] sm:$0xf] }
  0xe6   :  { %v2759_v13 = vor.u32 %v3309_v11, %v2758_v29  ;;  %v2931_v11 = vor.u32 %v3350_v9, %v2928_v5  ;;  %v3323_v9 = vld [vmem:[#allocation14 + $0x44] sm:$0xf0]  ;;  %v2998_v5 = vld [vmem:[#allocation14 + $0x1b0] sm:$0xf] }
  0xe7   :  { %v825_v23 = vadd.f32 %v824_v19, %v812_v18  ;;  %v2750_v18 = vld [vmem:[#allocation11 + $0x40] sm:$0xf]  ;;  %v3307_v19 = vld [vmem:[#allocation11 + $0x44] sm:$0xf0] }
  0xe8   :  { %1271 = vmatpush.bf16.msra.mxu0 %v2759_v13  ;;  %v2751_v21 = vor.u32 %v3307_v19, %v2750_v18  ;;  %v2902_v13 = vld [vmem:[#allocation14 + $0xf0] sm:$0xf]  ;;  %v3395_v19 = vld [vmem:[#allocation14 + $0x284] sm:$0xf0] }
  0xe9   :  { %v906_v27 = vmax.f32 %v825_v23, 0.0  ;;  %v2755_v23 = vor.u32 %v3306_v20, %v2752_v22  ;;  %v3094_v18 = vld [vmem:[#allocation14 + $0x270] sm:$0xf]  ;;  %v3344_v20 = vld [vmem:[#allocation14 + $0xf4] sm:$0xf]  ;;  %v2903_v22 = vor.u32 %v3347_v14, %v2902_v13 }
  0xea   :  { %v3368_v13 = vld [vmem:[#allocation14 + $0x1b4] sm:$0xf]  ;;  %v3000_v14 = vld [vmem:[#allocation14 + $0x1c8] sm:$0xf0] }
  0xeb   :  { %v908_v32 = vpack.c.bf16 %v906_v27, %v906_v27  ;;  %1285 = vmatpush.bf16.msra.mxu1 %v2755_v23  ;;  %v2904_v23 = vld [vmem:[#allocation14 + $0x108] sm:$0xf0] }
  0xec   :  { %v837_v34 = vpop.f32.mrf.mxu2  ;;  %v813_v36 = vpop.f32.mrf.mxu0  ;;  %1272 = vmatpush.bf16.msra.mxu0 %v2751_v21  ;;  %v2907_v26 = vor.u32 %v3344_v20, %v2904_v23  ;;  %v2782_v20 = vld [vmem:[#allocation14] sm:$0xf] }
  0xed   :  { %v850_v35 = vpop.f32.mrf.mxu3  ;;  %1116 = vmatmul.bf16.vlgmr.msrb.gmra.mxu0 %v908_v32  ;;  %1142 = vmatmul.bf16.vlgmr.msrb.gmra.mxu2 %v908_v32  ;;  %v826_v41 = vpop.f32.mrf.mxu1  ;;  %v838_v48 = vadd.f32 %v837_v34, %v267_v47  ;;  %v2734_v32 = vld [vmem:[#allocation11 + $0x20] sm:$0xf]  ;;  %v3303_v34 = vld [vmem:[#allocation11 + $0x24] sm:$0xf0] }
  0xee   :  { %v2735_v36 = vor.u32 %v3303_v34, %v2734_v32  ;;  %v3299_v47 = vld [vmem:[#allocation11 + $0x4] sm:$0xf0]  ;;  %v3389_v32 = vld [vmem:[#allocation14 + $0x254] sm:$0xf0] }
  0xef   :  { %v851_v49 = vadd.f32 %v850_v35, %v838_v48  ;;  %1286 = vmatpush.bf16.msra.mxu1 %v2747_v31  ;;  %v3302_v35 = vld [vmem:[#allocation11 + $0x24] sm:$0xf]  ;;  %v3099_v31 = vor.u32 %v3392_v24, %v3096_v25  ;;  %v3003_v24 = vor.u32 %v3368_v13, %v3000_v14  ;;  %v3387_v14 = vld [vmem:[#allocation14 + $0x24c] sm:$0xf] }
  0xf0   :  { %1273 = vmatpush.bf16.msra.mxu0 %v2743_v28  ;;  %v2739_v41 = vor.u32 %v3302_v35, %v2736_v37  ;;  %v3298_v48 = vld [vmem:[#allocation11 + $0x4] sm:$0xf]  ;;  %v3341_v28 = vld [vmem:[#allocation14 + $0xd4] sm:$0xf0]  ;;  %v2880_v35 = vld [vmem:[#allocation14 + $0xd8] sm:$0xf0] }
  0xf1   :  { %v3338_v34 = vld [vmem:[#allocation14 + $0xc4] sm:$0xf]  ;;  %v3072_v37 = vld [vmem:[#allocation14 + $0x258] sm:$0xf0]  ;;  %v2974_v25 = vld [vmem:[#allocation14 + $0x180] sm:$0xf] }
  0xf2   :  { %v2888_v13 = vld [vmem:[#allocation14 + $0xe0] sm:$0xf0] }
  0xf3   :  { %1287 = vmatpush.bf16.msra.mxu1 %v2739_v41 }
  0xf4   :  { %v839_v45 = vpop.f32.mrf.mxu2  ;;  %1274 = vmatpush.bf16.msra.mxu0 %v2735_v36  ;;  %v3386_v36 = vld [vmem:[#allocation14 + $0x244] sm:$0xf] }
  0xf5   :  { %v852_v46 = vpop.f32.mrf.mxu3  ;;  %v2731_v45 = vor.u32 %v3300_v42, %v2728_v43  ;;  %v3071_v42 = vor.u32 %v3389_v32, %v3070_v30  ;;  %v2883_v43 = vor.u32 %v3338_v34, %v2880_v35  ;;  %v3362_v30 = vld [vmem:[#allocation14 + $0x184] sm:$0xf]  ;;  %v2958_v34 = vld [vmem:[#allocation14 + $0x158] sm:$0xf]  ;;  %v3360_v35 = vld [vmem:[#allocation14 + $0x16c] sm:$0xf0] }
  0xf6   :  { %v2718_v46 = vld [vmem:[#allocation11] sm:$0xf] }
  0xf7   :  { %1288 = vmatpush.bf16.msra.mxu1 %v2731_v45  ;;  %v3335_v45 = vld [vmem:[#allocation14 + $0xa4] sm:$0xf0] }
  0xf8   :  { %1275 = vmatpush.bf16.msra.mxu0 %v2727_v44  ;;  %v2854_v44 = vld [vmem:[#allocation14 + $0x90] sm:$0xf] }
 0x104   :  { %v863_v50 = vpop.f32.mrf.mxu0 }
 0x105   :  { %v876_v51 = vpop.f32.mrf.mxu1  ;;  %v864_v52 = vadd.f32 %v863_v50, %v851_v49  ;;  %v2720_v49 = vld [vmem:[#allocation11 + $0x8] sm:$0xf0]  ;;  %v2719_v50 = vor.u32 %v3299_v47, %v2718_v46  ;;  %v3046_v46 = vld [vmem:[#allocation14 + $0x210] sm:$0xf] }
 0x107   :  { %v877_v53 = vadd.f32 %v876_v51, %v864_v52  ;;  %v2723_v51 = vor.u32 %v3298_v48, %v2720_v49  ;;  %v942_v52 = vld [vmem:[#allocation10] sm:$0x3]  ;;  %1276 = vmatpush.bf16.msra.mxu0 %v2719_v50  ;;  %v3075_v48 = vor.u32 %v3386_v36, %v3072_v37  ;;  %v3383_v49 = vld [vmem:[#allocation14 + $0x224] sm:$0xf0]  ;;  %v3332_v50 = vld [vmem:[#allocation14 + $0x94] sm:$0xf] }
 0x108   :  { %v3150_v36 = vld [vmem:[#allocation14 + $0x2d8] sm:$0xf] }
 0x109   :  { %1289 = vmatpush.bf16.msra.mxu1 %v2723_v51  ;;  %v2856_v51 = vld [vmem:[#allocation14 + $0xa8] sm:$0xf0] }
 0x10c   :  { %v889_v54 = vpop.f32.mrf.mxu2  ;;  %v865_v58 = vpop.f32.mrf.mxu0 }
 0x10d   :  { %v890_v55 = vadd.f32 %v889_v54, %v877_v53  ;;  %v902_v57 = vpop.f32.mrf.mxu3  ;;  %v878_v59 = vpop.f32.mrf.mxu1  ;;  %v944_v53 = vperm.slane %v942_v52, 0  ;;  %v945_v54 = vperm.slane %v942_v52, 1  ;;  %v3142_v58 = vld [vmem:[#allocation14 + $0x2d0] sm:$0xf] }
 0x10f   :  { %v903_v56 = vadd.f32 %v902_v57, %v890_v55  ;;  %v2950_v55 = vld [vmem:[#allocation14 + $0x150] sm:$0xf]  ;;  %v3359_v57 = vld [vmem:[#allocation14 + $0x164] sm:$0xf0] }
 0x110   :  { %v2951_v59 = vor.u32 %v3359_v57, %v2950_v55  ;;  %v3048_v55 = vld [vmem:[#allocation14 + $0x228] sm:$0xf0]  ;;  %v2830_v57 = vld [vmem:[#allocation14 + $0x60] sm:$0xf] }
 0x111   :  { %v907_v60 = vmax.f32 %v903_v56, 0.0  ;;  %v3407_v56 = vld [vmem:[#allocation14 + $0x2e4] sm:$0xf0] }
 0x112   :  { %1889 = vmatpush.bf16.msra.mxu2 %v2951_v59  ;;  %v2859_v59 = vor.u32 %v3332_v50, %v2856_v51  ;;  %v2934_v51 = vld [vmem:[#allocation14 + $0x128] sm:$0xf] }
 0x113   :  { %v909_v61 = vpack.c.bf16 %v907_v60, %v907_v60  ;;  %v3356_v60 = vld [vmem:[#allocation14 + $0x154] sm:$0xf] }
 0x114   :  { %v891_v4 = vpop.f32.mrf.mxu2 }
 0x115   :  { %v904_v62 = vpop.f32.mrf.mxu3  ;;  %1129 = vmatmul.bf16.vlgmr.msrb.gmra.mxu1 %v909_v61  ;;  %1155 = vmatmul.bf16.vlgmr.msrb.gmra.mxu3 %v909_v61  ;;  %v2952_v61 = vld [vmem:[#allocation14 + $0x168] sm:$0xf0]  ;;  %v3143_v4 = vor.u32 %v3407_v56, %v3142_v58  ;;  %v3047_v58 = vor.u32 %v3383_v49, %v3046_v46  ;;  %v3329_v56 = vld [vmem:[#allocation14 + $0x74] sm:$0xf0] }
 0x116   :  { %v2955_v62 = vor.u32 %v3356_v60, %v2952_v61  ;;  %1928 = vmatpush.bf16.msrb.mxu1 %v3147_v1  ;;  %1890 = vmatpush.bf16.msra.mxu2 %v2927_v7  ;;  %v3022_v60 = vld [vmem:[#allocation14 + $0x1e0] sm:$0xf]  ;;  %v3377_v61 = vld [vmem:[#allocation14 + $0x1f4] sm:$0xf0]  ;;  %v3024_v1 = vld [vmem:[#allocation14 + $0x1f8] sm:$0xf0]  ;;  %v2831_v2 = vor.u32 %v3329_v56, %v2830_v57  ;;  %v2835_v7 = vor.u32 %v3326_v63, %v2832_v38 }
 0x117   :  { %1902 = vmatpush.bf16.msra.mxu3 %v3143_v4  ;;  %v3023_v6 = vor.u32 %v3377_v61, %v3022_v60  ;;  %v3399_v57 = vld [vmem:[#allocation14 + $0x2ac] sm:$0xf]  ;;  %v2910_v61 = vld [vmem:[#allocation14 + $0xf8] sm:$0xf]  ;;  %v3396_v38 = vld [vmem:[#allocation14 + $0x28c] sm:$0xf0] }
 0x118   :  { %1915 = vmatpush.bf16.msrb.mxu0 %v2955_v62 }
 0x11a   :  { %1891 = vmatpush.bf16.msra.mxu2 %v2903_v22  ;;  %v3317_v22 = vld [vmem:[#allocation14 + $0x14] sm:$0xf0] }
 0x11b   :  { %1903 = vmatpush.bf16.msra.mxu3 %v3119_v8  ;;  %v2806_v8 = vld [vmem:[#allocation14 + $0x30] sm:$0xf]  ;;  %v2783_v32 = vor.u32 %v3317_v22, %v2782_v20  ;;  %v2862_v20 = vld [vmem:[#allocation14 + $0x98] sm:$0xf] }
 0x11c   :  { %1916 = vmatpush.bf16.msrb.mxu0 %v2931_v11  ;;  %v3320_v11 = vld [vmem:[#allocation14 + $0x34] sm:$0xf]  ;;  %v3336_v22 = vld [vmem:[#allocation14 + $0xac] sm:$0xf0] }
 0x120   :  { %1917 = vmatpush.bf16.msrb.mxu0 %v2907_v26  ;;  %v3314_v26 = vld [vmem:[#allocation14 + $0x4] sm:$0xf] }
 0x124   :  { %1918 = vmatpush.bf16.msrb.mxu0 %v2883_v43 }
 0x128   :  { %1919 = vmatpush.bf16.msrb.mxu0 %v2859_v59 }
 0x12c   :  { %1920 = vmatpush.bf16.msrb.mxu0 %v2835_v7 }
 0x16a   :  { %v3833_v17 = vpop.f32.mrf.mxu0 }
 0x16b   :  { %v1118_v29 = vadd.f32 %v3833_v17, %v944_v53  ;;  %v3095_v17 = vor.u32 %v3395_v19, %v3094_v18  ;;  %v3380_v53 = vld [vmem:[#allocation14 + $0x214] sm:$0xf] }
 0x16c   :  { %v3051_v62 = vor.u32 %v3380_v53, %v3048_v55  ;;  %v3126_v53 = vld [vmem:[#allocation14 + $0x2a8] sm:$0xf]  ;;  %v3402_v55 = vld [vmem:[#allocation14 + $0x2bc] sm:$0xf0] }
 0x16d   :  { %1904 = vmatpush.bf16.msra.mxu3 %v3095_v17  ;;  %v3365_v17 = vld [vmem:[#allocation14 + $0x194] sm:$0xf0]  ;;  %v3127_v56 = vor.u32 %v3402_v55, %v3126_v53  ;;  %v3321_v53 = vld [vmem:[#allocation14 + $0x3c] sm:$0xf] }
 0x170   :  { %v3835_v12 = vpop.f32.mrf.mxu2 }
 0x171   :  { %v1144_v39 = vadd.f32 %v3835_v12, %v945_v54  ;;  %v2855_v54 = vor.u32 %v3335_v45, %v2854_v44  ;;  %1905 = vmatpush.bf16.msra.mxu3 %v3071_v42  ;;  %v2975_v42 = vor.u32 %v3365_v17, %v2974_v25  ;;  %v3405_v44 = vld [vmem:[#allocation14 + $0x2dc] sm:$0xf]  ;;  %v3152_v45 = vld [vmem:[#allocation14 + $0x2f0] sm:$0xf0]  ;;  %v3384_v25 = vld [vmem:[#allocation14 + $0x22c] sm:$0xf0] }
 0x172   :  { %v1119_v16 = vpop.f32.mrf.mxu0  ;;  %v3333_v17 = vld [vmem:[#allocation14 + $0x9c] sm:$0xf] }
 0x173   :  { %v3123_v16 = vor.u32 %v3398_v10, %v3120_v33  ;;  %v3027_v10 = vor.u32 %v3374_v0, %v3024_v1  ;;  %v2808_v33 = vld [vmem:[#allocation14 + $0x48] sm:$0xf0]  ;;  %v3345_v0 = vld [vmem:[#allocation14 + $0xfc] sm:$0xf]  ;;  %v2912_v1 = vld [vmem:[#allocation14 + $0x110] sm:$0xf0] }
 0x174   :  { %v2811_v19 = vor.u32 %v3320_v11, %v2808_v33  ;;  %v3390_v11 = vld [vmem:[#allocation14 + $0x25c] sm:$0xf0]  ;;  %v3339_v33 = vld [vmem:[#allocation14 + $0xcc] sm:$0xf] }
 0x175   :  { %1929 = vmatpush.bf16.msrb.mxu1 %v3123_v16  ;;  %1906 = vmatpush.bf16.msra.mxu3 %v3047_v58  ;;  %v2807_v16 = vor.u32 %v3323_v9, %v2806_v8  ;;  %v3128_v58 = vld [vmem:[#allocation14 + $0x2c0] sm:$0xf0]  ;;  %v2915_v8 = vor.u32 %v3345_v0, %v2912_v1  ;;  %v2886_v9 = vld [vmem:[#allocation14 + $0xc8] sm:$0xf]  ;;  %v3363_v1 = vld [vmem:[#allocation14 + $0x18c] sm:$0xf] }
 0x176   :  { %1921 = vmatpush.bf16.msrb.mxu0 %v2811_v19  ;;  %v3131_v63 = vor.u32 %v3399_v57, %v3128_v58  ;;  %v2891_v19 = vor.u32 %v3339_v33, %v2888_v13  ;;  %v3008_v57 = vld [vmem:[#allocation14 + $0x1d0] sm:$0xf0]  ;;  %v3361_v33 = vld [vmem:[#allocation14 + $0x174] sm:$0xf0]  ;;  %v3158_v13 = vld [vmem:[#allocation14 + $0x2e0] sm:$0xf] }
 0x178   :  { %v1145_v27 = vpop.f32.mrf.mxu2 }
 0x179   :  { %v2878_v27 = vld [vmem:[#allocation14 + $0xc0] sm:$0xf]  ;;  %1930 = vmatpush.bf16.msrb.mxu1 %v3099_v31  ;;  %1907 = vmatpush.bf16.msra.mxu3 %v3023_v6  ;;  %v2976_v31 = vld [vmem:[#allocation14 + $0x198] sm:$0xf0] }
 0x17a   :  { %v2879_v40 = vor.u32 %v3341_v28, %v2878_v27  ;;  %v2784_v28 = vld [vmem:[#allocation14 + $0x18] sm:$0xf0] }
 0x17b   :  { %v2787_v43 = vor.u32 %v3314_v26, %v2784_v28  ;;  %v2864_v26 = vld [vmem:[#allocation14 + $0xb0] sm:$0xf0] }
 0x17c   :  { %1892 = vmatpush.bf16.msra.mxu2 %v2879_v40  ;;  %v3357_v40 = vld [vmem:[#allocation14 + $0x15c] sm:$0xf]  ;;  %v3056_v28 = vld [vmem:[#allocation14 + $0x230] sm:$0xf0] }
 0x17d   :  { %1931 = vmatpush.bf16.msrb.mxu1 %v3075_v48  ;;  %v2959_v48 = vor.u32 %v3360_v35, %v2958_v34  ;;  %1922 = vmatpush.bf16.msrb.mxu0 %v2787_v43  ;;  %v2838_v34 = vld [vmem:[#allocation14 + $0x68] sm:$0xf]  ;;  %v3330_v35 = vld [vmem:[#allocation14 + $0x7c] sm:$0xf0]  ;;  %v3032_v43 = vld [vmem:[#allocation14 + $0x200] sm:$0xf0] }
 0x180   :  { %1893 = vmatpush.bf16.msra.mxu2 %v2855_v54  ;;  %v2936_v54 = vld [vmem:[#allocation14 + $0x140] sm:$0xf0] }
 0x181   :  { %1932 = vmatpush.bf16.msrb.mxu1 %v3051_v62  ;;  %v3102_v62 = vld [vmem:[#allocation14 + $0x278] sm:$0xf] }
 0x182   :  { %v3103_v7 = vor.u32 %v3396_v38, %v3102_v62  ;;  %v3315_v62 = vld [vmem:[#allocation14 + $0xc] sm:$0xf] }
 0x184   :  { %1894 = vmatpush.bf16.msra.mxu2 %v2831_v2  ;;  %v3393_v2 = vld [vmem:[#allocation14 + $0x27c] sm:$0xf] }
 0x185   :  { %1933 = vmatpush.bf16.msrb.mxu1 %v3027_v10  ;;  %v3078_v10 = vld [vmem:[#allocation14 + $0x248] sm:$0xf] }
 0x188   :  { %1895 = vmatpush.bf16.msra.mxu2 %v2807_v16 }
 0x189   :  { %1934 = vmatpush.bf16.msrb.mxu1 %v3003_v24 }
 0x18c   :  { %1896 = vmatpush.bf16.msra.mxu2 %v2783_v32  ;;  %v2867_v32 = vor.u32 %v3333_v17, %v2864_v26  ;;  %v2942_v26 = vld [vmem:[#allocation14 + $0x130] sm:$0xf] }
 0x190   :  { %1941 = vmatpush.bf16.msrb.mxu2 %v2959_v48  ;;  %v2814_v48 = vld [vmem:[#allocation14 + $0x38] sm:$0xf] }
 0x192   :  { %v1130_v15 = vpop.f32.mrf.mxu1 }
 0x193   :  { %v3838_v21 = vadd.f32 %v1130_v15, %v1118_v29  ;;  %v3371_v29 = vld [vmem:[#allocation14 + $0x1c4] sm:$0xf0]  ;;  %v1163_v15 = vld [vmem:[#allocation5] sm:$0xff] }
 0x194   :  { %v2999_v18 = vor.u32 %v3371_v29, %v2998_v5  ;;  %v3342_v5 = vld [vmem:[#allocation14 + $0xdc] sm:$0xf0] }
 0x195   :  { %2165 = vst [vmem:[#allocation17] sm:$0xff] %v3838_v21  ;;  %v2887_v16 = vor.u32 %v3342_v5, %v2886_v9 }
 0x196   :  { %1908 = vmatpush.bf16.msra.mxu3 %v2999_v18  ;;  %v3079_v18 = vor.u32 %v3390_v11, %v3078_v10  ;;  %v2966_v11 = vld [vmem:[#allocation14 + $0x160] sm:$0xf] }
 0x198   :  { %v1156_v41 = vpop.f32.mrf.mxu3 }
 0x199   :  { %v1157_v47 = vadd.f32 %v1156_v41, %v1144_v39  ;;  %v3408_v39 = vld [vmem:[#allocation14 + $0x2ec] sm:$0xf0]  ;;  %v2960_v41 = vld [vmem:[#allocation14 + $0x170] sm:$0xf0] }
 0x19a   :  { %v1132_v52 = vpop.f32.mrf.mxu1  ;;  %v3151_v49 = vor.u32 %v3408_v39, %v3150_v36  ;;  %v2963_v50 = vor.u32 %v3357_v40, %v2960_v41  ;;  %1909 = vmatpush.bf16.msra.mxu3 %v2975_v42  ;;  %v3030_v36 = vld [vmem:[#allocation14 + $0x1e8] sm:$0xf]  ;;  %v3378_v39 = vld [vmem:[#allocation14 + $0x1fc] sm:$0xf0]  ;;  %v3327_v40 = vld [vmem:[#allocation14 + $0x6c] sm:$0xf] }
 0x19b   :  { %v1160_v12 = vmul.f32 0.5, %v1157_v47  ;;  %2166 = vst [vmem:[#allocation17 + $0x8] sm:$0xff] %v1157_v47  ;;  %v2979_v47 = vor.u32 %v3362_v30, %v2976_v31  ;;  %v3354_v52 = vld [vmem:[#allocation14 + $0x13c] sm:$0xf0]  ;;  %v2863_v30 = vor.u32 %v3336_v22, %v2862_v20  ;;  %v2840_v41 = vld [vmem:[#allocation14 + $0x80] sm:$0xf0] }
 0x19c   :  { %v2935_v59 = vor.u32 %v3354_v52, %v2934_v51  ;;  %v3375_v42 = vld [vmem:[#allocation14 + $0x1ec] sm:$0xf]  ;;  %v3372_v52 = vld [vmem:[#allocation14 + $0x1cc] sm:$0xf0]  ;;  %v3406_v20 = vld [vmem:[#allocation14 + $0x2e4] sm:$0xf] }
 0x19d   :  { %v1161_v4 = vmul.f32 1.442695, %v1160_v12  ;;  %v3351_v12 = vld [vmem:[#allocation14 + $0x12c] sm:$0xf]  ;;  %1935 = vmatpush.bf16.msrb.mxu1 %v2979_v47  ;;  %v3035_v47 = vor.u32 %v3375_v42, %v3032_v43  ;;  %v3160_v22 = vld [vmem:[#allocation14 + $0x2f8] sm:$0xf0] }
 0x19e   :  { %1954 = vmatpush.bf16.msrb.mxu3 %v3151_v49  ;;  %v2939_v60 = vor.u32 %v3351_v12, %v2936_v54  ;;  %1942 = vmatpush.bf16.msrb.mxu2 %v2935_v59  ;;  %v3324_v49 = vld [vmem:[#allocation14 + $0x4c] sm:$0xf0]  ;;  %v3369_v54 = vld [vmem:[#allocation14 + $0x1bc] sm:$0xf]  ;;  %v2790_v59 = vld [vmem:[#allocation14 + $0x8] sm:$0xf] }
 0x19f   :  { %3424 = vpow2.f32 %v1161_v4  ;;  %v3348_v4 = vld [vmem:[#allocation14 + $0x10c] sm:$0xf0]  ;;  %v2815_v51 = vor.u32 %v3324_v49, %v2814_v48  ;;  %v3011_v58 = vor.u32 %v3369_v54, %v3008_v57  ;;  %v2918_v43 = vld [vmem:[#allocation14 + $0x100] sm:$0xf]  ;;  %v3397_v48 = vld [vmem:[#allocation14 + $0x294] sm:$0xf0] }
 0x1a0   :  { %v1158_v3 = vpop.f32.mrf.mxu3  ;;  %v2911_v6 = vor.u32 %v3348_v4, %v2910_v61  ;;  %v3366_v4 = vld [vmem:[#allocation14 + $0x19c] sm:$0xf0]  ;;  %v3346_v49 = vld [vmem:[#allocation14 + $0x104] sm:$0xf]  ;;  %2188 = dma.vmem_to_hbm [thread:$0]  %s2184_s16, 256, %s2186_s18, [#allocation18]  }
 0x1a1   :  { %v3104_v3 = vld [vmem:[#allocation14 + $0x290] sm:$0xf0] }
 0x1a2   :  { %1955 = vmatpush.bf16.msrb.mxu3 %v3127_v56  ;;  %v3107_v29 = vor.u32 %v3393_v2, %v3104_v3  ;;  %1943 = vmatpush.bf16.msrb.mxu2 %v2911_v6  ;;  %v3318_v56 = vld [vmem:[#allocation14 + $0x1c] sm:$0xf0]  ;;  %v2984_v2 = vld [vmem:[#allocation14 + $0x1a0] sm:$0xf0]  ;;  %v1183_v6 = vld [vmem:[#allocation13] sm:$0x3] }
 0x1a3   :  { %v2791_v61 = vor.u32 %v3318_v56, %v2790_v59  ;;  %v2987_v3 = vor.u32 %v3363_v1, %v2984_v2  ;;  %v3391_v59 = vld [vmem:[#allocation14 + $0x264] sm:$0xf0]  ;;  %v3340_v56 = vld [vmem:[#allocation14 + $0xd4] sm:$0xf] }
 0x1a5   :  { %v3425_v23 = vpop.eup %3424 }
 0x1a6   :  { %v1164_v27 = vmul.f32 %v3425_v23, %v1163_v15  ;;  %v3080_v15 = vld [vmem:[#allocation14 + $0x260] sm:$0xf0]  ;;  %1956 = vmatpush.bf16.msrb.mxu3 %v3103_v7  ;;  %v3054_v23 = vld [vmem:[#allocation14 + $0x218] sm:$0xf]  ;;  %1944 = vmatpush.bf16.msrb.mxu2 %v2887_v16  ;;  %v1185_v7 = vperm.slane %v1183_v6, 0 }
 0x1a7   :  { %v3083_v24 = vor.u32 %v3387_v14, %v3080_v15  ;;  %v3055_v31 = vor.u32 %v3384_v25, %v3054_v23  ;;  %v3409_v14 = vld [vmem:[#allocation14 + $0x2f4] sm:$0xf0]  ;;  %v3358_v15 = vld [vmem:[#allocation14 + $0x164] sm:$0xf]  ;;  %v2968_v16 = vld [vmem:[#allocation14 + $0x178] sm:$0xf0]  ;;  %v2967_v25 = vor.u32 %v3361_v33, %v2966_v11 }
 0x1a8   :  { %v1165_v37 = vadd.f32 %v1164_v27, %v3838_v21  ;;  %v3155_v21 = vor.u32 %v3405_v44, %v3152_v45  ;;  %v3381_v27 = vld [vmem:[#allocation14 + $0x21c] sm:$0xf]  ;;  %v2839_v44 = vor.u32 %v3330_v35, %v2838_v34  ;;  %v3031_v45 = vor.u32 %v3378_v39, %v3030_v36  ;;  %v3352_v34 = vld [vmem:[#allocation14 + $0x134] sm:$0xf]  ;;  %v2944_v35 = vld [vmem:[#allocation14 + $0x148] sm:$0xf0] }
 0x1a9   :  { %v3159_v17 = vor.u32 %v3409_v14, %v3158_v13  ;;  %v3400_v36 = vld [vmem:[#allocation14 + $0x2b4] sm:$0xf]  ;;  %v2846_v11 = vld [vmem:[#allocation14 + $0x70] sm:$0xf]  ;;  %v3331_v33 = vld [vmem:[#allocation14 + $0x84] sm:$0xf0] }
 0x1aa   :  { %v1166_v46 = vpack.c.bf16 %v1165_v37, %v1165_v37  ;;  %1957 = vmatpush.bf16.msrb.mxu3 %v3079_v18  ;;  %v3059_v37 = vor.u32 %v3381_v27, %v3056_v28  ;;  %1945 = vmatpush.bf16.msrb.mxu2 %v2863_v30  ;;  %v3355_v27 = vld [vmem:[#allocation14 + $0x144] sm:$0xf0]  ;;  %v2971_v28 = vor.u32 %v3358_v15, %v2968_v16  ;;  %v3038_v15 = vld [vmem:[#allocation14 + $0x1f0] sm:$0xf] }
 0x1ab   :  { %v3163_v30 = vor.u32 %v3406_v20, %v3160_v22  ;;  %v3379_v16 = vld [vmem:[#allocation14 + $0x204] sm:$0xf0]  ;;  %v3376_v20 = vld [vmem:[#allocation14 + $0x1f4] sm:$0xf]  ;;  %v3040_v22 = vld [vmem:[#allocation14 + $0x208] sm:$0xf0] }
 0x1ac   :  { %1277 = vmatmul.bf16.vlgmr.msra.gmra.mxu0 %v1166_v46  ;;  %1290 = vmatmul.bf16.vlgmr.msra.gmra.mxu1 %v1166_v46  ;;  %v2843_v46 = vor.u32 %v3327_v40, %v2840_v41  ;;  %v2943_v41 = vor.u32 %v3355_v27, %v2942_v26  ;;  %v2822_v26 = vld [vmem:[#allocation14 + $0x40] sm:$0xf]  ;;  %v3325_v27 = vld [vmem:[#allocation14 + $0x54] sm:$0xf0] }
 0x1ad   :  { %1967 = vmatpush.bf16.msra.mxu0 %v2963_v50  ;;  %1980 = vmatpush.bf16.msra.mxu1 %v3155_v21  ;;  %v3006_v50 = vld [vmem:[#allocation14 + $0x1b8] sm:$0xf]  ;;  %v2816_v21 = vld [vmem:[#allocation14 + $0x50] sm:$0xf0] }
 0x1ae   :  { %1958 = vmatpush.bf16.msrb.mxu3 %v3055_v31  ;;  %1946 = vmatpush.bf16.msrb.mxu2 %v2839_v44  ;;  %v3007_v55 = vor.u32 %v3372_v52, %v3006_v50  ;;  %v2819_v12 = vor.u32 %v3321_v53, %v2816_v21  ;;  %v3134_v31 = vld [vmem:[#allocation14 + $0x2b0] sm:$0xf]  ;;  %v3349_v44 = vld [vmem:[#allocation14 + $0x114] sm:$0xf0]  ;;  %v2920_v50 = vld [vmem:[#allocation14 + $0x118] sm:$0xf0] }
 0x1af   :  { %v3112_v52 = vld [vmem:[#allocation14 + $0x298] sm:$0xf0]  ;;  %v2919_v53 = vor.u32 %v3349_v44, %v2918_v43  ;;  %v2923_v54 = vor.u32 %v3346_v49, %v2920_v50  ;;  %v3364_v49 = vld [vmem:[#allocation14 + $0x194] sm:$0xf]  ;;  %v2992_v50 = vld [vmem:[#allocation14 + $0x1a8] sm:$0xf0] }
 0x1b1   :  { %1968 = vmatpush.bf16.msra.mxu0 %v2939_v60  ;;  %1981 = vmatpush.bf16.msra.mxu1 %v3131_v63  ;;  %v2982_v60 = vld [vmem:[#allocation14 + $0x188] sm:$0xf]  ;;  %v2792_v63 = vld [vmem:[#allocation14 + $0x20] sm:$0xf0] }
 0x1b2   :  { %1959 = vmatpush.bf16.msrb.mxu3 %v3031_v45  ;;  %1947 = vmatpush.bf16.msrb.mxu2 %v2815_v51  ;;  %v2983_v38 = vor.u32 %v3366_v4, %v2982_v60  ;;  %v2795_v0 = vor.u32 %v3315_v62, %v2792_v63  ;;  %v2947_v45 = vor.u32 %v3352_v34, %v2944_v35  ;;  %v3394_v51 = vld [vmem:[#allocation14 + $0x284] sm:$0xf]  ;;  %v2896_v60 = vld [vmem:[#allocation14 + $0xe8] sm:$0xf0]  ;;  %v2824_v35 = vld [vmem:[#allocation14 + $0x58] sm:$0xf0] }
 0x1b3   :  { %v3115_v57 = vor.u32 %v3394_v51, %v3112_v52  ;;  %v3088_v4 = vld [vmem:[#allocation14 + $0x268] sm:$0xf0]  ;;  %v2899_v1 = vor.u32 %v3340_v56, %v2896_v60  ;;  %v3322_v34 = vld [vmem:[#allocation14 + $0x44] sm:$0xf] }
 0x1b4   :  { %v2827_v43 = vor.u32 %v3322_v34, %v2824_v35 }
 0x1b5   :  { %1969 = vmatpush.bf16.msra.mxu0 %v2915_v8  ;;  %1982 = vmatpush.bf16.msra.mxu1 %v3107_v29  ;;  %v1186_v8 = vperm.slane %v1183_v6, 1  ;;  %v3385_v6 = vld [vmem:[#allocation14 + $0x234] sm:$0xf0] }
 0x1b6   :  { %1960 = vmatpush.bf16.msrb.mxu3 %v3007_v55  ;;  %1948 = vmatpush.bf16.msrb.mxu2 %v2791_v61  ;;  %v2894_v55 = vld [vmem:[#allocation14 + $0xd0] sm:$0xf]  ;;  %v3388_v61 = vld [vmem:[#allocation14 + $0x254] sm:$0xf] }
 0x1b7   :  { %v3091_v2 = vor.u32 %v3388_v61, %v3088_v4 }
 0x1b9   :  { %1970 = vmatpush.bf16.msra.mxu0 %v2891_v19  ;;  %1983 = vmatpush.bf16.msra.mxu1 %v3083_v24 }
 0x1ba   :  { %1961 = vmatpush.bf16.msrb.mxu3 %v2983_v38  ;;  %v2870_v38 = vld [vmem:[#allocation14 + $0xa0] sm:$0xf] }
 0x1bd   :  { %1971 = vmatpush.bf16.msra.mxu0 %v2867_v32  ;;  %1984 = vmatpush.bf16.msra.mxu1 %v3059_v37  ;;  %v3403_v32 = vld [vmem:[#allocation14 + $0x2c4] sm:$0xf0]  ;;  %v3136_v37 = vld [vmem:[#allocation14 + $0x2c8] sm:$0xf0] }
 0x1be   :  { %v3135_v42 = vor.u32 %v3403_v32, %v3134_v31  ;;  %v3014_v31 = vld [vmem:[#allocation14 + $0x1c0] sm:$0xf]  ;;  %v3373_v32 = vld [vmem:[#allocation14 + $0x1d4] sm:$0xf0] }
 0x1c1   :  { %1972 = vmatpush.bf16.msra.mxu0 %v2843_v46  ;;  %1985 = vmatpush.bf16.msra.mxu1 %v3035_v47  ;;  %v3139_v46 = vor.u32 %v3400_v36, %v3136_v37  ;;  %v3110_v47 = vld [vmem:[#allocation14 + $0x280] sm:$0xf]  ;;  %v3370_v36 = vld [vmem:[#allocation14 + $0x1c4] sm:$0xf]  ;;  %v3016_v37 = vld [vmem:[#allocation14 + $0x1d8] sm:$0xf0] }
 0x1c2   :  { %v3111_v21 = vor.u32 %v3397_v48, %v3110_v47  ;;  %v3019_v44 = vor.u32 %v3370_v36, %v3016_v37  ;;  %v3316_v47 = vld [vmem:[#allocation14 + $0x14] sm:$0xf]  ;;  %v2800_v48 = vld [vmem:[#allocation14 + $0x28] sm:$0xf0] }
 0x1c5   :  { %1973 = vmatpush.bf16.msra.mxu0 %v2819_v12  ;;  %1986 = vmatpush.bf16.msra.mxu1 %v3011_v58  ;;  %v3343_v12 = vld [vmem:[#allocation14 + $0xe4] sm:$0xf0]  ;;  %v3086_v58 = vld [vmem:[#allocation14 + $0x250] sm:$0xf] }
 0x1c6   :  { %v2895_v62 = vor.u32 %v3343_v12, %v2894_v55  ;;  %v3087_v63 = vor.u32 %v3391_v59, %v3086_v58  ;;  %v3865_v55 = vld [vmem:[%s3885_s9] sm:$0x3f]  ;;  %s3717_s9 = smov [#allocation16]  }
 0x1c7   :  { %v1398_v12 = vperm.slane %v3865_v55, 1  ;;  %s2172_s11 = sshll.u32 %s3717_s9, 4  ;;  %s2173_s11 = int_to_ptr.vmem [resolvable:$true] %s2172_s11 }
 0x1c9   :  { %1974 = vmatpush.bf16.msra.mxu0 %v2795_v0  ;;  %1987 = vmatpush.bf16.msra.mxu1 %v2987_v3  ;;  %v3337_v0 = vld [vmem:[#allocation14 + $0xb4] sm:$0xf0]  ;;  %v3062_v3 = vld [vmem:[#allocation14 + $0x220] sm:$0xf] }
 0x229   :  { %v1278_v9 = vpop.f32.mrf.mxu0  ;;  %v1291_v5 = vpop.f32.mrf.mxu1 }
 0x22a   :  { %v1279_v10 = vadd.f32 %v1278_v9, %v1185_v7  ;;  %v1292_v29 = vadd.f32 %v1291_v5, %v1186_v8  ;;  %v3334_v7 = vld [vmem:[#allocation14 + $0xa4] sm:$0xf]  ;;  %v2872_v8 = vld [vmem:[#allocation14 + $0xb8] sm:$0xf0] }
 0x22b   :  { %v3382_v9 = vld [vmem:[#allocation14 + $0x224] sm:$0xf]  ;;  %v3064_v5 = vld [vmem:[#allocation14 + $0x238] sm:$0xf0]  ;;  %v2875_v13 = vor.u32 %v3334_v7, %v2872_v8 }
 0x22c   :  { %v1295_v18 = vmax.f32 %v1279_v10, 0.0  ;;  %v1296_v19 = vmax.f32 %v1292_v29, 0.0  ;;  %v2871_v10 = vor.u32 %v3337_v0, %v2870_v38  ;;  %v3063_v29 = vor.u32 %v3385_v6, %v3062_v3 }
 0x22d   :  { %v3067_v14 = vor.u32 %v3382_v9, %v3064_v5  ;;  %v1400_v3 = vperm.slane %v3865_v55, 3 }
 0x22e   :  { %v3843_v23 = vpack.c.bf16 %v1295_v18, %v1295_v18  ;;  %v3845_v24 = vpack.c.bf16 %v1296_v19, %v1296_v19  ;;  %v3328_v18 = vld [vmem:[#allocation14 + $0x74] sm:$0xf]  ;;  %v2848_v19 = vld [vmem:[#allocation14 + $0x88] sm:$0xf0] }
 0x230   :  { %1897 = vmatmul.bf16.vlgmr.msra.gmra.mxu2 %v3843_v23  ;;  %1910 = vmatmul.bf16.vlgmr.msra.gmra.mxu3 %v3845_v24 }
 0x231   :  { %1923 = vmatmul.bf16.vlgmr.msrb.gmra.mxu0 %v3843_v23  ;;  %1936 = vmatmul.bf16.vlgmr.msrb.gmra.mxu1 %v3845_v24  ;;  %v1280_v39 = vpop.f32.mrf.mxu0  ;;  %v1293_v40 = vpop.f32.mrf.mxu1 }
 0x232   :  { %1993 = vmatpush.bf16.msra.mxu2 %v2967_v25  ;;  %2006 = vmatpush.bf16.msra.mxu3 %v3159_v17  ;;  %v2847_v25 = vor.u32 %v3331_v33, %v2846_v11  ;;  %v3039_v17 = vor.u32 %v3379_v16, %v3038_v15  ;;  %v2823_v39 = vor.u32 %v3325_v27, %v2822_v26 }
 0x233   :  { %2019 = vmatpush.bf16.msrb.mxu0 %v2971_v28  ;;  %2032 = vmatpush.bf16.msrb.mxu1 %v3163_v30  ;;  %v2851_v28 = vor.u32 %v3328_v18, %v2848_v19  ;;  %v3043_v30 = vor.u32 %v3376_v20, %v3040_v22  ;;  %v3015_v40 = vor.u32 %v3373_v32, %v3014_v31 }
 0x236   :  { %1994 = vmatpush.bf16.msra.mxu2 %v2943_v41  ;;  %2007 = vmatpush.bf16.msra.mxu3 %v3135_v42  ;;  %v2798_v41 = vld [vmem:[#allocation14 + $0x10] sm:$0xf]  ;;  %v3319_v42 = vld [vmem:[#allocation14 + $0x24] sm:$0xf0] }
 0x237   :  { %2020 = vmatpush.bf16.msrb.mxu0 %v2947_v45  ;;  %2033 = vmatpush.bf16.msrb.mxu1 %v3139_v46  ;;  %v2990_v45 = vld [vmem:[#allocation14 + $0x190] sm:$0xf]  ;;  %v3367_v46 = vld [vmem:[#allocation14 + $0x1a4] sm:$0xf0]  ;;  %v2799_v51 = vor.u32 %v3319_v42, %v2798_v41 }
 0x238   :  { %v2991_v52 = vor.u32 %v3367_v46, %v2990_v45 }
 0x23a   :  { %1995 = vmatpush.bf16.msra.mxu2 %v2919_v53  ;;  %2008 = vmatpush.bf16.msra.mxu3 %v3111_v21  ;;  %v2803_v53 = vor.u32 %v3316_v47, %v2800_v48  ;;  %v2995_v21 = vor.u32 %v3364_v49, %v2992_v50 }
 0x23b   :  { %2021 = vmatpush.bf16.msrb.mxu0 %v2923_v54  ;;  %2034 = vmatpush.bf16.msrb.mxu1 %v3115_v57 }
 0x23e   :  { %1996 = vmatpush.bf16.msra.mxu2 %v2895_v62  ;;  %2009 = vmatpush.bf16.msra.mxu3 %v3087_v63 }
 0x23f   :  { %2022 = vmatpush.bf16.msrb.mxu0 %v2899_v1  ;;  %2035 = vmatpush.bf16.msrb.mxu1 %v3091_v2 }
 0x240   :  { %1949 = vmatmul.bf16.vlgmr.msrb.gmra.mxu2 %v3843_v23  ;;  %1962 = vmatmul.bf16.vlgmr.msrb.gmra.mxu3 %v3845_v24 }
 0x241   :  { %1975 = vmatmul.bf16.vlgmr.msra.gmra.mxu0 %v3843_v23  ;;  %1988 = vmatmul.bf16.vlgmr.msra.gmra.mxu1 %v3845_v24 }
 0x242   :  { %1997 = vmatpush.bf16.msra.mxu2 %v2871_v10  ;;  %2010 = vmatpush.bf16.msra.mxu3 %v3063_v29  ;;  %v1399_v10 = vperm.slane %v3865_v55, 2 }
 0x243   :  { %2023 = vmatpush.bf16.msrb.mxu0 %v2875_v13  ;;  %2036 = vmatpush.bf16.msrb.mxu1 %v3067_v14 }
 0x246   :  { %1998 = vmatpush.bf16.msra.mxu2 %v2847_v25  ;;  %2011 = vmatpush.bf16.msra.mxu3 %v3039_v17 }
 0x247   :  { %2024 = vmatpush.bf16.msrb.mxu0 %v2851_v28  ;;  %2037 = vmatpush.bf16.msrb.mxu1 %v3043_v30 }
 0x24a   :  { %1999 = vmatpush.bf16.msra.mxu2 %v2823_v39  ;;  %2012 = vmatpush.bf16.msra.mxu3 %v3015_v40  ;;  %v1402_v40 = vperm.slane %v3865_v55, 5 }
 0x24b   :  { %2025 = vmatpush.bf16.msrb.mxu0 %v2827_v43  ;;  %2038 = vmatpush.bf16.msrb.mxu1 %v3019_v44 }
 0x24e   :  { %2000 = vmatpush.bf16.msra.mxu2 %v2799_v51  ;;  %2013 = vmatpush.bf16.msra.mxu3 %v2991_v52 }
 0x24f   :  { %2026 = vmatpush.bf16.msrb.mxu0 %v2803_v53  ;;  %2039 = vmatpush.bf16.msrb.mxu1 %v2995_v21  ;;  %v1401_v21 = vperm.slane %v3865_v55, 4 }
 0x251   :  { %2001 = vmatmul.bf16.vlgmr.msra.gmra.mxu2 %v3843_v23  ;;  %2014 = vmatmul.bf16.vlgmr.msra.gmra.mxu3 %v3845_v24 }
 0x252   :  { %2027 = vmatmul.bf16.vlgmr.msrb.gmra.mxu0 %v3843_v23  ;;  %2040 = vmatmul.bf16.vlgmr.msrb.gmra.mxu1 %v3845_v24  ;;  %v1397_v24 = vperm.slane %v3865_v55, 0 }
 0x2ae   :  { %v1924_v54 = vpop.f32.mrf.mxu0  ;;  %v1937_v23 = vpop.f32.mrf.mxu1 }
 0x2af   :  { %v1925_v57 = vadd.f32 %v1924_v54, %v1398_v12 }
 0x2b1   :  { %v1938_v58 = vadd.f32 %v1937_v23, %v1925_v57 }
 0x2b3   :  { %v3165_v59 = vmul.f32 -1.442695, %v1938_v58  ;;  %v1898_v56 = vpop.f32.mrf.mxu2  ;;  %v1911_v60 = vpop.f32.mrf.mxu3 }
 0x2b4   :  { %v1899_v61 = vadd.f32 %v1898_v56, %v1397_v24 }
 0x2b5   :  { %3426 = vpow2.f32 %v3165_v59 }
 0x2b6   :  { %v1912_v4 = vadd.f32 %v1911_v60, %v1899_v61  ;;  %v1926_v62 = vpop.f32.mrf.mxu0  ;;  %v1939_v63 = vpop.f32.mrf.mxu1 }
 0x2b8   :  { %v3164_v38 = vmul.f32 -1.442695, %v1912_v4 }
 0x2ba   :  { %3428 = vpow2.f32 %v3164_v38 }
 0x2bb   :  { %v3427_v0 = vpop.eup %3426  ;;  %v1900_v1 = vpop.f32.mrf.mxu2 }
 0x2bc   :  { %v1913_v2 = vpop.f32.mrf.mxu3  ;;  %v2064_v6 = vadd.f32 1.0, %v3427_v0 }
 0x2be   :  { %3430 = vrcp.f32 %v2064_v6  ;;  %v1976_v7 = vpop.f32.mrf.mxu0  ;;  %v1989_v8 = vpop.f32.mrf.mxu1  ;;  %v2095_v17 = vand.u32 2147483648, %v2064_v6  ;;  %v2093_v30 = vand.u32 2147483647, %v2064_v6  ;;  %vm2089_vm1 = vweird.f32 %v2064_v6 }
 0x2bf   :  { %v1977_v9 = vadd.f32 %v1976_v7, %v1400_v3 }
 0x2c0   :  { %v3429_v5 = vpop.eup %3428  ;;  %v2096_v37 = vor.u32 1.1754944e-38, %v2095_v17  ;;  %vm2094_vm3 = vcmp.eq.f32.partialorder %v2093_v30, 8.507059e+37 }
 0x2c1   :  { %v2063_v29 = vadd.f32 1.0, %v3429_v5  ;;  %v1990_v11 = vadd.f32 %v1989_v8, %v1977_v9 }
 0x2c3   :  { %3432 = vrcp.f32 %v2063_v29  ;;  %v1950_v33 = vpop.f32.mrf.mxu2  ;;  %v3167_v15 = vmul.f32 -1.442695, %v1990_v11  ;;  %v2080_v42 = vand.u32 2147483648, %v2063_v29  ;;  %v2078_v46 = vand.u32 2147483647, %v2063_v29 }
 0x2c4   :  { %v1963_v13 = vpop.f32.mrf.mxu3  ;;  %v3431_v14 = vpop.eup %3430  ;;  %v1951_v16 = vadd.f32 %v1950_v33, %v1399_v10  ;;  %vm2074_vm5 = vweird.f32 %v2063_v29 }
 0x2c5   :  { %v2085_v18 = vmul.f32 %v3431_v14, %v2064_v6  ;;  %3434 = vpow2.f32 %v3167_v15  ;;  %vm2090_vm0 = vweird.f32 %v3431_v14  ;;  %v2081_v52 = vor.u32 1.1754944e-38, %v2080_v42 }
 0x2c6   :  { %v1964_v19 = vadd.f32 %v1963_v13, %v1951_v16  ;;  %v1978_v20 = vpop.f32.mrf.mxu0  ;;  %v1991_v22 = vpop.f32.mrf.mxu1  ;;  %vm2091_vm2 = vmor %vm2089_vm1, %vm2090_vm0  ;;  %vm2079_vm7 = vcmp.eq.f32.partialorder %v2078_v46, 8.507059e+37 }
 0x2c7   :  { %v2086_v25 = vsub.f32 1.0, %v2085_v18 }
 0x2c8   :  { %v3166_v26 = vmul.f32 -1.442695, %v1964_v19 }
 0x2c9   :  { %v3433_v27 = vpop.eup %3432  ;;  %v2087_v28 = vmul.f32 %v3431_v14, %v2086_v25 }
 0x2ca   :  { %v2070_v31 = vmul.f32 %v3433_v27, %v2063_v29  ;;  %3436 = vpow2.f32 %v3166_v26  ;;  %vm2075_vm4 = vweird.f32 %v3433_v27 }
 0x2cb   :  { %v2088_v32 = vadd.f32 %v3431_v14, %v2087_v28  ;;  %v1952_v34 = vpop.f32.mrf.mxu2  ;;  %v3435_v36 = vpop.eup %3434  ;;  %vm2076_vm6 = vmor %vm2074_vm5, %vm2075_vm4 }
 0x2cc   :  { %v1965_v35 = vpop.f32.mrf.mxu3  ;;  %v2071_v39 = vsub.f32 1.0, %v2070_v31  ;;  %v2066_v43 = vadd.f32 1.0, %v3435_v36 }
 0x2cd   :  { %v2092_v41 = vsel %vm2091_vm2, %v3431_v14, %v2088_v32 }
 0x2ce   :  { %v2097_v44 = vsel %vm2094_vm3, %v2096_v37, %v2092_v41  ;;  %v2072_v45 = vmul.f32 %v3433_v27, %v2071_v39  ;;  %3438 = vrcp.f32 %v2066_v43  ;;  %v2123_v0 = vand.u32 2147483647, %v2066_v43 }
 0x2cf   :  { %2160 = vst [vmem:[#allocation16 + $0x8] sm:$0xff] %v2097_v44  ;;  %v2028_v47 = vpop.f32.mrf.mxu0  ;;  %v2041_v48 = vpop.f32.mrf.mxu1  ;;  %v2125_v55 = vand.u32 2147483648, %v2066_v43  ;;  %vm2119_vm9 = vweird.f32 %v2066_v43 }
 0x2d0   :  { %v3437_v49 = vpop.eup %3436  ;;  %v2073_v50 = vadd.f32 %v3433_v27, %v2072_v45  ;;  %v2029_v51 = vadd.f32 %v2028_v47, %v1402_v40  ;;  %vm2124_vm11 = vcmp.eq.f32.partialorder %v2123_v0, 8.507059e+37 }
 0x2d1   :  { %v2065_v53 = vadd.f32 1.0, %v3437_v49  ;;  %v2126_v10 = vor.u32 1.1754944e-38, %v2125_v55 }
 0x2d2   :  { %v2077_v12 = vsel %vm2076_vm6, %v3433_v27, %v2073_v50  ;;  %v2042_v54 = vadd.f32 %v2041_v48, %v2029_v51 }
 0x2d3   :  { %v2082_v23 = vsel %vm2079_vm7, %v2081_v52, %v2077_v12  ;;  %3440 = vrcp.f32 %v2065_v53  ;;  %v2110_v29 = vand.u32 2147483648, %v2065_v53  ;;  %v2108_v14 = vand.u32 2147483647, %v2065_v53 }
 0x2d4   :  { %2159 = vst [vmem:[#allocation16] sm:$0xff] %v2082_v23  ;;  %v3169_v57 = vmul.f32 -1.442695, %v2042_v54  ;;  %v2002_v24 = vpop.f32.mrf.mxu2  ;;  %v2015_v58 = vpop.f32.mrf.mxu3  ;;  %vm2104_vm13 = vweird.f32 %v2065_v53 }
 0x2d5   :  { %v3439_v59 = vpop.eup %3438  ;;  %v2003_v56 = vadd.f32 %v2002_v24, %v1401_v21  ;;  %v2111_v19 = vor.u32 1.1754944e-38, %v2110_v29  ;;  %vm2109_vm15 = vcmp.eq.f32.partialorder %v2108_v14, 8.507059e+37 }
 0x2d6   :  { %v2115_v60 = vmul.f32 %v3439_v59, %v2066_v43  ;;  %3442 = vpow2.f32 %v3169_v57  ;;  %vm2120_vm8 = vweird.f32 %v3439_v59 }
 0x2d7   :  { %v2016_v61 = vadd.f32 %v2015_v58, %v2003_v56  ;;  %v2030_v4 = vpop.f32.mrf.mxu0  ;;  %v2043_v62 = vpop.f32.mrf.mxu1  ;;  %vm2121_vm10 = vmor %vm2119_vm9, %vm2120_vm8 }
 0x2d8   :  { %v2116_v63 = vsub.f32 1.0, %v2115_v60 }
 0x2d9   :  { %v3441_v38 = vpop.eup %3440  ;;  %v3168_v1 = vmul.f32 -1.442695, %v2016_v61 }
 0x2da   :  { %v2117_v2 = vmul.f32 %v3439_v59, %v2116_v63  ;;  %v2100_v3 = vmul.f32 %v3441_v38, %v2065_v53  ;;  %vm2105_vm12 = vweird.f32 %v3441_v38 }
 0x2db   :  { %3444 = vpow2.f32 %v3168_v1  ;;  %vm2106_vm14 = vmor %vm2104_vm13, %vm2105_vm12 }
 0x2dc   :  { %v3443_v6 = vpop.eup %3442  ;;  %v2118_v7 = vadd.f32 %v3439_v59, %v2117_v2  ;;  %v2101_v8 = vsub.f32 1.0, %v2100_v3  ;;  %v2004_v9 = vpop.f32.mrf.mxu2 }
 0x2dd   :  { %v2017_v5 = vpop.f32.mrf.mxu3  ;;  %v2068_v11 = vadd.f32 1.0, %v3443_v6 }
 0x2de   :  { %v2122_v33 = vsel %vm2121_vm10, %v3439_v59, %v2118_v7  ;;  %v2102_v13 = vmul.f32 %v3441_v38, %v2101_v8 }
 0x2df   :  { %v2127_v15 = vsel %vm2124_vm11, %v2126_v10, %v2122_v33  ;;  %3446 = vrcp.f32 %v2068_v11  ;;  %v2155_v28 = vand.u32 2147483648, %v2068_v11  ;;  %v2153_v32 = vand.u32 2147483647, %v2068_v11 }
 0x2e0   :  { %2162 = vst [vmem:[#allocation16 + $0x18] sm:$0xff] %v2127_v15  ;;  %v2103_v16 = vadd.f32 %v3441_v38, %v2102_v13  ;;  %vm2149_vm1 = vweird.f32 %v2068_v11 }
 0x2e1   :  { %v3445_v18 = vpop.eup %3444  ;;  %v2156_v36 = vor.u32 1.1754944e-38, %v2155_v28  ;;  %vm2154_vm3 = vcmp.eq.f32.partialorder %v2153_v32, 8.507059e+37 }
 0x2e2   :  { %v2107_v20 = vsel %vm2106_vm14, %v3441_v38, %v2103_v16  ;;  %v2067_v22 = vadd.f32 1.0, %v3445_v18 }
 0x2e3   :  { %v2112_v25 = vsel %vm2109_vm15, %v2111_v19, %v2107_v20 }
 0x2e4   :  { %2161 = vst [vmem:[#allocation16 + $0x10] sm:$0xff] %v2112_v25  ;;  %3448 = vrcp.f32 %v2067_v22  ;;  %v2140_v40 = vand.u32 2147483648, %v2067_v22  ;;  %v2138_v43 = vand.u32 2147483647, %v2067_v22  ;;  %vm2134_vm5 = vweird.f32 %v2067_v22 }
 0x2e5   :  { %v3447_v17 = vpop.eup %3446 }
 0x2e6   :  { %v2145_v26 = vmul.f32 %v3447_v17, %v2068_v11  ;;  %vm2150_vm0 = vweird.f32 %v3447_v17  ;;  %v2141_v45 = vor.u32 1.1754944e-38, %v2140_v40  ;;  %vm2139_vm7 = vcmp.eq.f32.partialorder %v2138_v43, 8.507059e+37 }
 0x2e7   :  { %vm2151_vm2 = vmor %vm2149_vm1, %vm2150_vm0 }
 0x2e8   :  { %v2146_v27 = vsub.f32 1.0, %v2145_v26 }
 0x2ea   :  { %v3449_v30 = vpop.eup %3448  ;;  %v2147_v31 = vmul.f32 %v3447_v17, %v2146_v27 }
 0x2eb   :  { %v2130_v34 = vmul.f32 %v3449_v30, %v2067_v22  ;;  %vm2135_vm4 = vweird.f32 %v3449_v30 }
 0x2ec   :  { %v2148_v35 = vadd.f32 %v3447_v17, %v2147_v31  ;;  %vm2136_vm6 = vmor %vm2134_vm5, %vm2135_vm4 }
 0x2ed   :  { %v2131_v37 = vsub.f32 1.0, %v2130_v34 }
 0x2ee   :  { %v2152_v39 = vsel %vm2151_vm2, %v3447_v17, %v2148_v35 }
 0x2ef   :  { %v2157_v41 = vsel %vm2154_vm3, %v2156_v36, %v2152_v39  ;;  %v2132_v42 = vmul.f32 %v3449_v30, %v2131_v37 }
 0x2f0   :  { %2164 = vst [vmem:[#allocation16 + $0x28] sm:$0xff] %v2157_v41 }
 0x2f1   :  { %v2133_v44 = vadd.f32 %v3449_v30, %v2132_v42 }
 0x2f3   :  { %v2137_v46 = vsel %vm2136_vm6, %v3449_v30, %v2133_v44 }
 0x2f4   :  { %v2142_v47 = vsel %vm2139_vm7, %v2141_v45, %v2137_v46 }
 0x2f5   :  { %2163 = vst [vmem:[#allocation16 + $0x20] sm:$0xff] %v2142_v47 }
 0x2f6   :  { %2177 = dma.vmem_to_hbm [thread:$0]  %s2173_s11, 768, %s2175_s22, [#allocation4]  }
 0x2f7   :  { %3700 = dma.done.wait [#allocation4], 768  }
 0x2f8   :  { %3701 = vsyncadd [#allocation4], 4294966528 }
 0x2f9   :  { %3702 = dma.done.wait [#allocation18], 256  }
 0x2fa   :  { %3703 = vsyncadd [#allocation18], 4294967040 }
 0x2fb   :  { %2197 = vsyncpa [#allocation3], 1 }
 0x2fc   :  { %2198 = vsyncpa [#allocation6], 1 }
 0x2fd   :  { %2199 = vsyncpa [#allocation9], 1 }
 0x2fe   :  { %2200 = vsyncpa [#allocation12], 1 }
 0x2ff   :  { %2201 = vsyncpa [#allocation15], 1 }
 0x300   :  { %2202 = vsyncpa [#allocation4], 1 }
 0x301   :  { %2203 = vsyncpa [#allocation18], 1 }

</bundles_post_ra>
